<compile_context>
chip_gen: v6e
topology: v6e:2x2x1
jax: 0.10.0
libtpu: 0.0.40
codegen_flags: <defaults>
</compile_context>

<pallas_src>
import jax
import jax.numpy as jnp
from jax.experimental import pallas as pl
from jax.experimental.pallas import tpu as pltpu

BN_EPS = 1e-5
LANE = 128


def _round_up(x, m):
    return (x + m - 1) // m * m


# ---------------------------------------------------------------------------
# Kernels
# ---------------------------------------------------------------------------
def _conv1x1_bias_relu6_kernel(x_ref, w_ref, b_ref, o_ref):
    """1x1 conv (matmul) + folded-BN bias + ReLU6."""
    y = jnp.dot(x_ref[...], w_ref[...], preferred_element_type=jnp.float32)
    o_ref[...] = jnp.clip(y + b_ref[...], 0.0, 6.0).astype(o_ref.dtype)


def _dw_pw_fused_kernel(taps_ref, w2_ref, b2_ref, w3_ref, b3_ref, o_ref):
    """Grouped 3x3 s2 conv (single K=9*C matmul) + BN + ReLU6,
    fused with pointwise 1x1 conv + BN + ReLU6."""
    mid = jnp.dot(taps_ref[...], w2_ref[...], preferred_element_type=jnp.float32)
    mid = jnp.clip(mid + b2_ref[...], 0.0, 6.0)
    mid = mid.astype(w3_ref.dtype)
    y = jnp.dot(mid, w3_ref[...], preferred_element_type=jnp.float32)
    o_ref[...] = jnp.clip(y + b3_ref[...], 0.0, 6.0).astype(o_ref.dtype)


# ---------------------------------------------------------------------------
# pallas_call wrappers (row-tiled, parallel grid, double-buffered pipeline)
# ---------------------------------------------------------------------------
def conv1x1_bias_relu6(x2d, w, b, *, tile_m=512, out_dtype=None):
    m, cin = x2d.shape
    cout = w.shape[1]
    out_dtype = out_dtype or x2d.dtype
    tile = min(tile_m, _round_up(m, 8))
    mp = _round_up(m, tile)
    if mp != m:
        x2d = jnp.pad(x2d, ((0, mp - m), (0, 0)))
    out = pl.pallas_call(
        _conv1x1_bias_relu6_kernel,
        out_shape=jax.ShapeDtypeStruct((mp, cout), out_dtype),
        grid=(mp // tile,),
        in_specs=[
            pl.BlockSpec((tile, cin), lambda i: (i, 0)),
            pl.BlockSpec((cin, cout), lambda i: (0, 0)),
            pl.BlockSpec((1, cout), lambda i: (0, 0)),
        ],
        out_specs=pl.BlockSpec((tile, cout), lambda i: (i, 0)),
        compiler_params=pltpu.CompilerParams(
            dimension_semantics=("parallel",)),
    )(x2d, w, b)
    return out[:m]


def dw3x3_s2_pw_fused(taps, w2, b2, w3, b3, *, tile_m=512,
                      out_dtype=jnp.float32):
    m, k = taps.shape
    c_mid = w2.shape[1]
    c_out = w3.shape[1]
    tile = min(tile_m, _round_up(m, 8))
    mp = _round_up(m, tile)
    if mp != m:
        taps = jnp.pad(taps, ((0, mp - m), (0, 0)))
    out = pl.pallas_call(
        _dw_pw_fused_kernel,
        out_shape=jax.ShapeDtypeStruct((mp, c_out), out_dtype),
        grid=(mp // tile,),
        in_specs=[
            pl.BlockSpec((tile, k), lambda i: (i, 0)),
            pl.BlockSpec((k, c_mid), lambda i: (0, 0)),
            pl.BlockSpec((1, c_mid), lambda i: (0, 0)),
            pl.BlockSpec((c_mid, c_out), lambda i: (0, 0)),
            pl.BlockSpec((1, c_out), lambda i: (0, 0)),
        ],
        out_specs=pl.BlockSpec((tile, c_out), lambda i: (i, 0)),
        compiler_params=pltpu.CompilerParams(
            dimension_semantics=("parallel",)),
    )(taps, w2, b2, w3, b3)
    return out[:m]


# ---------------------------------------------------------------------------
# One-time parameter folding (BN fold, block-diag dw weight, lane padding)
# ---------------------------------------------------------------------------
def fold_params(p, in_channels, out_channels, expansion, *,
                compute_dtype=jnp.bfloat16, lane=LANE):
    e = expansion
    c_exp = in_channels * e
    c_exp_p = _round_up(c_exp, lane)
    c_out_p = _round_up(out_channels, lane)

    def bn_fold(gamma, beta, mean, var):
        s = gamma / jnp.sqrt(var + BN_EPS)
        return s, beta - mean * s

    # --- stage 1: expansion 1x1 ---
    s1, b1 = bn_fold(*p["bn1"])
    w1 = jnp.transpose(p["w_exp"][:, :, 0, 0], (1, 0)) * s1[None, :]   # (Cin, Cexp)
    w1 = jnp.pad(w1, ((0, 0), (0, c_exp_p - c_exp)))
    b1 = jnp.pad(b1, (0, c_exp_p - c_exp)).reshape(1, -1)

    # --- stage 2: grouped 3x3 s2 -> dense block-diagonal (9*Cexp_p, Cexp_p) ---
    s2, b2 = bn_fold(*p["bn2"])
    cin_idx = jnp.arange(c_exp)
    cout_idx = jnp.arange(c_exp)
    same_group = (cin_idx[:, None] // e) == (cout_idx[None, :] // e)    # (Cin, Cout)
    # w_dw: (Cexp_out, e_in, 3, 3); dense[cin, cout] = w_dw[cout, cin % e]
    gathered = p["w_dw"][cout_idx[None, :], (cin_idx % e)[:, None]]     # (Cin, Cout, 3, 3)
    wbd = jnp.where(same_group[:, :, None, None], gathered, 0.0)
    wbd = wbd * s2[None, :, None, None]                                 # fold BN2 scale
    wbd = jnp.transpose(wbd, (2, 3, 0, 1))                              # (3, 3, Cin, Cout)
    wbd = jnp.pad(wbd, ((0, 0), (0, 0),
                        (0, c_exp_p - c_exp), (0, c_exp_p - c_exp)))
    w2 = wbd.reshape(9 * c_exp_p, c_exp_p)                              # K = t*Cexp_p + cin
    b2 = jnp.pad(b2, (0, c_exp_p - c_exp)).reshape(1, -1)

    # --- stage 3: pointwise 1x1 ---
    s3, b3 = bn_fold(*p["bn3"])
    w3 = jnp.transpose(p["w_pw"][:, :, 0, 0], (1, 0)) * s3[None, :]     # (Cexp, Cout)
    w3 = jnp.pad(w3, ((0, c_exp_p - c_exp), (0, c_out_p - out_channels)))
    b3 = jnp.pad(b3, (0, c_out_p - out_channels)).reshape(1, -1)

    return {
        "w1": w1.astype(compute_dtype), "b1": b1.astype(jnp.float32),
        "w2": w2.astype(compute_dtype), "b2": b2.astype(jnp.float32),
        "w3": w3.astype(compute_dtype), "b3": b3.astype(jnp.float32),
    }


# ---------------------------------------------------------------------------
# Forward pass (glue in plain JAX, hot paths in Pallas)
# ---------------------------------------------------------------------------
def block_for_stride_two_forward(x_nchw, fp, in_channels, out_channels,
                                 expansion):
    n, cin, h, w = x_nchw.shape
    c_exp_p = fp["w1"].shape[1]
    dt = fp["w1"].dtype

    x = jnp.transpose(x_nchw, (0, 2, 3, 1)).astype(dt)                  # NHWC
    x2d = x.reshape(n * h * w, cin)

    # 1) expansion 1x1 conv + folded BN + ReLU6  (tiled rows, lane-dense out)
    y1 = conv1x1_bias_relu6(x2d, fp["w1"], fp["b1"], tile_m=512, out_dtype=dt)
    y1 = y1.reshape(n, h, w, c_exp_p)

    # 2+3) fused: grouped 3x3 s2 conv + BN + ReLU6, then 1x1 pw + BN + ReLU6
    ho = (h + 2 - 3) // 2 + 1
    wo = (w + 2 - 3) // 2 + 1
    xp = jnp.pad(y1, ((0, 0), (1, 1), (1, 1), (0, 0)))
    taps = []
    for kh in range(3):
        for kw in range(3):
            taps.append(
                xp[:, kh:kh + 2 * ho - 1:2, kw:kw + 2 * wo - 1:2, :]
                .reshape(n * ho * wo, c_exp_p))
    # tap-major along K: one contiguous (M, 9*Cexp) slab -> single K=9*C dot
    taps = jnp.concatenate(taps, axis=-1)

    y = dw3x3_s2_pw_fused(taps, fp["w2"], fp["b2"], fp["w3"], fp["b3"],
                          tile_m=512, out_dtype=jnp.float32)            # (M, Cout_p)
    y = y[:, :out_channels].reshape(n, ho, wo, out_channels)
    out = jnp.transpose(y, (0, 3, 1, 2))

    if in_channels == out_channels:
        # Mirrors the PyTorch residual add; with stride 2 the spatial shapes
        # differ, so (exactly like the PyTorch module) this would error.
        out = out + x_nchw
    return out


# ---------------------------------------------------------------------------
# Pure-JAX reference (for correctness check only)
# ---------------------------------------------------------------------------
def reference_forward(x_nchw, p, in_channels, out_channels, expansion):
    dn = ("NHWC", "HWIO", "NHWC")

    def bn_relu6(y, gamma, beta, mean, var):
        y = (y - mean) / jnp.sqrt(var + BN_EPS) * gamma + beta
        return jnp.clip(y, 0.0, 6.0)

    x = jnp.transpose(x_nchw, (0, 2, 3, 1))
    k1 = jnp.transpose(p["w_exp"], (2, 3, 1, 0))
    y = jax.lax.conv_general_dilated(x, k1, (1, 1), "VALID", dimension_numbers=dn)
    y = bn_relu6(y, *p["bn1"])
    k2 = jnp.transpose(p["w_dw"], (2, 3, 1, 0))
    y = jax.lax.conv_general_dilated(y, k2, (2, 2), ((1, 1), (1, 1)),
                                     dimension_numbers=dn,
                                     feature_group_count=in_channels)
    y = bn_relu6(y, *p["bn2"])
    k3 = jnp.transpose(p["w_pw"], (2, 3, 1, 0))
    y = jax.lax.conv_general_dilated(y, k3, (1, 1), "VALID", dimension_numbers=dn)
    y = bn_relu6(y, *p["bn3"])
    out = jnp.transpose(y, (0, 3, 1, 2))
    if in_channels == out_channels:
        out = out + x_nchw
    return out


# ---------------------------------------------------------------------------
if __name__ == "__main__":
    in_channels, out_channels, expansion = 4, 8, 6
    n, h, w = 2, 16, 16
    c_exp = in_channels * expansion

    keys = jax.random.split(jax.random.PRNGKey(0), 16)

    def bn_params(k, c):
        k0, k1, k2, k3 = jax.random.split(k, 4)
        return (1.0 + 0.1 * jax.random.normal(k0, (c,), jnp.float32),   # gamma
                0.1 * jax.random.normal(k1, (c,), jnp.float32),         # beta
                0.05 * jax.random.normal(k2, (c,), jnp.float32),        # running_mean
                jax.random.uniform(k3, (c,), jnp.float32, 0.5, 1.5))    # running_var

    params = {
        "w_exp": 0.2 * jax.random.normal(keys[0], (c_exp, in_channels, 1, 1), jnp.float32),
        "w_dw":  0.2 * jax.random.normal(keys[1], (c_exp, expansion, 3, 3), jnp.float32),
        "w_pw":  0.2 * jax.random.normal(keys[2], (out_channels, c_exp, 1, 1), jnp.float32),
        "bn1": bn_params(keys[3], c_exp),
        "bn2": bn_params(keys[4], c_exp),
        "bn3": bn_params(keys[5], out_channels),
    }

    x = jax.random.normal(keys[15], (n, in_channels, h, w), jnp.float32)

    ref = reference_forward(x, params, in_channels, out_channels, expansion)
    ref = jax.block_until_ready(ref)

    fwd = jax.jit(block_for_stride_two_forward, static_argnums=(2, 3, 4))

    # f32 path: tight numerical check of the kernel algorithm.
    fp32 = fold_params(params, in_channels, out_channels, expansion,
                       compute_dtype=jnp.float32)
    out_f32 = jax.block_until_ready(
        fwd(x, fp32, in_channels, out_channels, expansion))
    assert out_f32.shape == (n, out_channels, h // 2, w // 2), out_f32.shape
    assert jnp.allclose(out_f32, ref, atol=2e-4, rtol=2e-4), \
        float(jnp.max(jnp.abs(out_f32 - ref)))

    # bf16 path (performance configuration): f32 MXU accumulation, looser check.
    fpbf16 = fold_params(params, in_channels, out_channels, expansion,
                         compute_dtype=jnp.bfloat16)
    out_bf16 = jax.block_until_ready(
        fwd(x, fpbf16, in_channels, out_channels, expansion))
    assert out_bf16.shape == (n, out_channels, h // 2, w // 2), out_bf16.shape
    assert jnp.allclose(out_bf16, ref, atol=2e-1, rtol=5e-2), \
        float(jnp.max(jnp.abs(out_bf16 - ref)))

    print("KERNEL_OK")
</pallas_src>

<mosaic_0001>
module attributes {stable_mosaic.version = 11 : i64} {
  func.func @_conv1x1_bias_relu6_kernel(%arg0: i32, %arg1: memref<512x4xf32, #tpu.memory_space<vmem>>, %arg2: memref<4x128xf32, #tpu.memory_space<vmem>>, %arg3: memref<1x128xf32, #tpu.memory_space<vmem>>, %arg4: memref<512x128xf32, #tpu.memory_space<vmem>>) attributes {dimension_semantics = [#tpu.dimension_semantics<parallel>], iteration_bounds = array<i64: 1>, scalar_prefetch = 0 : i64, scratch_operands = 0 : i64, tpu.core_type = #tpu.core_type<tc>, window_params = [{transform_indices = @transform_0, window_bounds = array<i64: 512, 4>}, {pipeline_mode = #tpu.pipeline_mode<synchronous>, transform_indices = @transform_1, window_bounds = array<i64: 4, 128>}, {pipeline_mode = #tpu.pipeline_mode<synchronous>, transform_indices = @transform_2, window_bounds = array<i64: 1, 128>}, {transform_indices = @transform_3, window_bounds = array<i64: 512, 128>}]} {
    %c0 = arith.constant 0 : index
    %c0_0 = arith.constant 0 : index
    %0 = vector.load %arg1[%c0, %c0_0] : memref<512x4xf32, #tpu.memory_space<vmem>>, vector<512x4xf32>
    %c0_1 = arith.constant 0 : index
    %c0_2 = arith.constant 0 : index
    %1 = vector.load %arg2[%c0_1, %c0_2] : memref<4x128xf32, #tpu.memory_space<vmem>>, vector<4x128xf32>
    %cst = arith.constant dense<0.000000e+00> : vector<512x128xf32>
    %2 = tpu.matmul %0, %1, %cst {dimension_numbers = #tpu.dot_dimension_numbers<[1], [0], [0], [1], [0, 0, 1, 1], [], []>} : vector<512x4xf32>, vector<4x128xf32>, vector<512x128xf32> -> vector<512x128xf32>
    %c0_3 = arith.constant 0 : index
    %c0_4 = arith.constant 0 : index
    %3 = vector.load %arg3[%c0_3, %c0_4] : memref<1x128xf32, #tpu.memory_space<vmem>>, vector<1x128xf32>
    %4 = vector.broadcast %3 : vector<1x128xf32> to vector<512x128xf32>
    %5 = arith.addf %2, %4 : vector<512x128xf32>
    %cst_5 = arith.constant 0.000000e+00 : f32
    %cst_6 = arith.constant 6.000000e+00 : f32
    %6 = vector.broadcast %cst_5 : f32 to vector<512x128xf32>
    %7 = arith.maximumf %6, %5 : vector<512x128xf32>
    %8 = vector.broadcast %cst_6 : f32 to vector<512x128xf32>
    %9 = arith.minimumf %8, %7 : vector<512x128xf32>
    %c0_7 = arith.constant 0 : index
    %c0_8 = arith.constant 0 : index
    %10 = vector.load %arg4[%c0_7, %c0_8] : memref<512x128xf32, #tpu.memory_space<vmem>>, vector<512x128xf32>
    tpu.vector_store %arg4[%c0_7, %c0_8], %9 {strides = array<i32>} : memref<512x128xf32, #tpu.memory_space<vmem>>, vector<512x128xf32>,
    return
  }
  func.func @transform_0(%arg0: i32) -> (i32, i32) {
    %c0_i32 = arith.constant 0 : i32
    %c0_i32_0 = arith.constant 0 : i32
    return %arg0, %c0_i32 : i32, i32
  }
  func.func @transform_1(%arg0: i32) -> (i32, i32) {
    %c0_i32 = arith.constant 0 : i32
    %c0_i32_0 = arith.constant 0 : i32
    %c0_i32_1 = arith.constant 0 : i32
    return %c0_i32, %c0_i32_0 : i32, i32
  }
  func.func @transform_2(%arg0: i32) -> (i32, i32) {
    %c0_i32 = arith.constant 0 : i32
    %c0_i32_0 = arith.constant 0 : i32
    %c0_i32_1 = arith.constant 0 : i32
    return %c0_i32, %c0_i32_0 : i32, i32
  }
  func.func @transform_3(%arg0: i32) -> (i32, i32) {
    %c0_i32 = arith.constant 0 : i32
    %c0_i32_0 = arith.constant 0 : i32
    return %arg0, %c0_i32 : i32, i32
  }
}

module attributes {stable_mosaic.version = 11 : i64} {
  func.func @_dw_pw_fused_kernel(%arg0: i32, %arg1: memref<128x1152xf32, #tpu.memory_space<vmem>>, %arg2: memref<1152x128xf32, #tpu.memory_space<vmem>>, %arg3: memref<1x128xf32, #tpu.memory_space<vmem>>, %arg4: memref<128x128xf32, #tpu.memory_space<vmem>>, %arg5: memref<1x128xf32, #tpu.memory_space<vmem>>, %arg6: memref<128x128xf32, #tpu.memory_space<vmem>>) attributes {dimension_semantics = [#tpu.dimension_semantics<parallel>], iteration_bounds = array<i64: 1>, scalar_prefetch = 0 : i64, scratch_operands = 0 : i64, tpu.core_type = #tpu.core_type<tc>, window_params = [{transform_indices = @transform_0, window_bounds = array<i64: 128, 1152>}, {pipeline_mode = #tpu.pipeline_mode<synchronous>, transform_indices = @transform_1, window_bounds = array<i64: 1152, 128>}, {pipeline_mode = #tpu.pipeline_mode<synchronous>, transform_indices = @transform_2, window_bounds = array<i64: 1, 128>}, {pipeline_mode = #tpu.pipeline_mode<synchronous>, transform_indices = @transform_3, window_bounds = array<i64: 128, 128>}, {pipeline_mode = #tpu.pipeline_mode<synchronous>, transform_indices = @transform_4, window_bounds = array<i64: 1, 128>}, {transform_indices = @transform_5, window_bounds = array<i64: 128, 128>}]} {
    %c0 = arith.constant 0 : index
    %c0_0 = arith.constant 0 : index
    %0 = vector.load %arg1[%c0, %c0_0] : memref<128x1152xf32, #tpu.memory_space<vmem>>, vector<128x1152xf32>
    %c0_1 = arith.constant 0 : index
    %c0_2 = arith.constant 0 : index
    %1 = vector.load %arg2[%c0_1, %c0_2] : memref<1152x128xf32, #tpu.memory_space<vmem>>, vector<1152x128xf32>
    %cst = arith.constant dense<0.000000e+00> : vector<128x128xf32>
    %2 = tpu.matmul %0, %1, %cst {dimension_numbers = #tpu.dot_dimension_numbers<[1], [0], [0], [1], [0, 0, 1, 1], [], []>} : vector<128x1152xf32>, vector<1152x128xf32>, vector<128x128xf32> -> vector<128x128xf32>
    %c0_3 = arith.constant 0 : index
    %c0_4 = arith.constant 0 : index
    %3 = vector.load %arg3[%c0_3, %c0_4] : memref<1x128xf32, #tpu.memory_space<vmem>>, vector<1x128xf32>
    %4 = vector.broadcast %3 : vector<1x128xf32> to vector<128x128xf32>
    %5 = arith.addf %2, %4 : vector<128x128xf32>
    %cst_5 = arith.constant 0.000000e+00 : f32
    %cst_6 = arith.constant 6.000000e+00 : f32
    %6 = vector.broadcast %cst_5 : f32 to vector<128x128xf32>
    %7 = arith.maximumf %6, %5 : vector<128x128xf32>
    %8 = vector.broadcast %cst_6 : f32 to vector<128x128xf32>
    %9 = arith.minimumf %8, %7 : vector<128x128xf32>
    %c0_7 = arith.constant 0 : index
    %c0_8 = arith.constant 0 : index
    %10 = vector.load %arg4[%c0_7, %c0_8] : memref<128x128xf32, #tpu.memory_space<vmem>>, vector<128x128xf32>
    %cst_9 = arith.constant dense<0.000000e+00> : vector<128x128xf32>
    %11 = tpu.matmul %9, %10, %cst_9 {dimension_numbers = #tpu.dot_dimension_numbers<[1], [0], [0], [1], [0, 0, 1, 1], [], []>} : vector<128x128xf32>, vector<128x128xf32>, vector<128x128xf32> -> vector<128x128xf32>
    %c0_10 = arith.constant 0 : index
    %c0_11 = arith.constant 0 : index
    %12 = vector.load %arg5[%c0_10, %c0_11] : memref<1x128xf32, #tpu.memory_space<vmem>>, vector<1x128xf32>
    %13 = vector.broadcast %12 : vector<1x128xf32> to vector<128x128xf32>
    %14 = arith.addf %11, %13 : vector<128x128xf32>
    %cst_12 = arith.constant 0.000000e+00 : f32
    %cst_13 = arith.constant 6.000000e+00 : f32
    %15 = vector.broadcast %cst_12 : f32 to vector<128x128xf32>
    %16 = arith.maximumf %15, %14 : vector<128x128xf32>
    %17 = vector.broadcast %cst_13 : f32 to vector<128x128xf32>
    %18 = arith.minimumf %17, %16 : vector<128x128xf32>
    %c0_14 = arith.constant 0 : index
    %c0_15 = arith.constant 0 : index
    %19 = vector.load %arg6[%c0_14, %c0_15] : memref<128x128xf32, #tpu.memory_space<vmem>>, vector<128x128xf32>
    tpu.vector_store %arg6[%c0_14, %c0_15], %18 {strides = array<i32>} : memref<128x128xf32, #tpu.memory_space<vmem>>, vector<128x128xf32>,
    return
  }
  func.func @transform_0(%arg0: i32) -> (i32, i32) {
    %c0_i32 = arith.constant 0 : i32
    %c0_i32_0 = arith.constant 0 : i32
    return %arg0, %c0_i32 : i32, i32
  }
  func.func @transform_1(%arg0: i32) -> (i32, i32) {
    %c0_i32 = arith.constant 0 : i32
    %c0_i32_0 = arith.constant 0 : i32
    %c0_i32_1 = arith.constant 0 : i32
    return %c0_i32, %c0_i32_0 : i32, i32
  }
  func.func @transform_2(%arg0: i32) -> (i32, i32) {
    %c0_i32 = arith.constant 0 : i32
    %c0_i32_0 = arith.constant 0 : i32
    %c0_i32_1 = arith.constant 0 : i32
    return %c0_i32, %c0_i32_0 : i32, i32
  }
  func.func @transform_3(%arg0: i32) -> (i32, i32) {
    %c0_i32 = arith.constant 0 : i32
    %c0_i32_0 = arith.constant 0 : i32
    %c0_i32_1 = arith.constant 0 : i32
    return %c0_i32, %c0_i32_0 : i32, i32
  }
  func.func @transform_4(%arg0: i32) -> (i32, i32) {
    %c0_i32 = arith.constant 0 : i32
    %c0_i32_0 = arith.constant 0 : i32
    %c0_i32_1 = arith.constant 0 : i32
    return %c0_i32, %c0_i32_0 : i32, i32
  }
  func.func @transform_5(%arg0: i32) -> (i32, i32) {
    %c0_i32 = arith.constant 0 : i32
    %c0_i32_0 = arith.constant 0 : i32
    return %arg0, %c0_i32 : i32, i32
  }
}

</mosaic_0001>

<bundles_post_ra>
// kernel: block_for_stride_two_forward.2
= control target key start
LH: loop header
LB: loop body
LE: loop exit
PB: predicated region body
PF: predicated region fallthrough
CT: control target
= control target key end

     0   :  { %vm279_vm0 = vcmask 1043456   ;;  %vm86_vm1 = vcmask 31744   ;;  %s1635_s1 = inlined_call_operand.vmem [shape: f32[4,128], index: 1, kind: input, shape index: {}]   ;;  %s1636_s0 = inlined_call_operand.vmem [shape: f32[512,4], index: 0, kind: input, shape index: {}]   ;;  %s1637_s2 = inlined_call_operand.vmem [shape: f32[1,128], index: 2, kind: input, shape index: {}]   ;;  %s1638_s3 = inlined_call_operand.vmem [shape: f32[512,128], index: 3, kind: output, shape index: {}]  }
   0x1   :  { %v78_v0 = vld [vmem:[%s1635_s1] sm:$0xf]  ;;  %v15_v3 = vld [vmem:[%s1636_s0 + $0x8] sm:$0xff]  ;;  %v16_v5 = vld [vmem:[%s1636_s0 + $0x10] sm:$0xff] }
   0x2   :  { %v14_v1 = vld [vmem:[%s1636_s0] sm:$0xff]  ;;  %995 = vmatprep.subr.msk.mxu0 %vm279_vm0, %v78_v0  ;;  %1093 = vmatprep.subr.msk.mxu1 %vm279_vm0, %v78_v0  ;;  %v47_v4 = vld [vmem:[%s1636_s0 + $0x108] sm:$0xff]  ;;  %v48_v6 = vld [vmem:[%s1636_s0 + $0x110] sm:$0xff] }
   0x3   :  { %v46_v2 = vld [vmem:[%s1636_s0 + $0x100] sm:$0xff]  ;;  %996 = vmatpush3.msk.msra.mxu0 %vm279_vm0, %v78_v0  ;;  %1094 = vmatpush3.msk.msra.mxu1 %vm279_vm0, %v78_v0  ;;  %v17_v7 = vld [vmem:[%s1636_s0 + $0x18] sm:$0xff]  ;;  %v19_v11 = vld [vmem:[%s1636_s0 + $0x28] sm:$0xff] }
   0x4   :  { %997 = vmatprep.mubr.msk.f32.mxu0 %vm86_vm1, %v14_v1  ;;  %1045 = vmatprep.mubr.msk.f32.mxu1 %vm86_vm1, %v46_v2  ;;  %v49_v8 = vld [vmem:[%s1636_s0 + $0x118] sm:$0xff]  ;;  %v18_v9 = vld [vmem:[%s1636_s0 + $0x20] sm:$0xff]  ;;  %v51_v12 = vld [vmem:[%s1636_s0 + $0x128] sm:$0xff] }
   0x5   :  { %998 = vmatmul.mubr.msk.f32.vlgmr.msra.gmra.mxu0 %vm86_vm1, %v15_v3  ;;  %1046 = vmatmul.mubr.msk.f32.vlgmr.msra.gmra.mxu1 %vm86_vm1, %v47_v4  ;;  %v50_v10 = vld [vmem:[%s1636_s0 + $0x120] sm:$0xff]  ;;  %v20_v13 = vld [vmem:[%s1636_s0 + $0x30] sm:$0xff]  ;;  %v21_v15 = vld [vmem:[%s1636_s0 + $0x38] sm:$0xff] }
   0x6   :  { %1000 = vmatprep.mubr.msk.f32.mxu0 %vm86_vm1, %v16_v5  ;;  %1048 = vmatprep.mubr.msk.f32.mxu1 %vm86_vm1, %v48_v6  ;;  %v52_v14 = vld [vmem:[%s1636_s0 + $0x130] sm:$0xff]  ;;  %v53_v16 = vld [vmem:[%s1636_s0 + $0x138] sm:$0xff]  ;;  %v22_v17 = vld [vmem:[%s1636_s0 + $0x40] sm:$0xff] }
   0x7   :  { %v54_v18 = vld [vmem:[%s1636_s0 + $0x140] sm:$0xff]  ;;  %v23_v19 = vld [vmem:[%s1636_s0 + $0x48] sm:$0xff]  ;;  %v24_v21 = vld [vmem:[%s1636_s0 + $0x50] sm:$0xff] }
   0x8   :  { %v55_v20 = vld [vmem:[%s1636_s0 + $0x148] sm:$0xff]  ;;  %v56_v22 = vld [vmem:[%s1636_s0 + $0x150] sm:$0xff]  ;;  %v25_v23 = vld [vmem:[%s1636_s0 + $0x58] sm:$0xff] }
   0x9   :  { %1001 = vmatmul.mubr.msk.f32.gmra.mxu0 %vm86_vm1, %v17_v7  ;;  %1049 = vmatmul.mubr.msk.f32.gmra.mxu1 %vm86_vm1, %v49_v8  ;;  %v57_v24 = vld [vmem:[%s1636_s0 + $0x158] sm:$0xff]  ;;  %v26_v25 = vld [vmem:[%s1636_s0 + $0x60] sm:$0xff]  ;;  %v27_v27 = vld [vmem:[%s1636_s0 + $0x68] sm:$0xff] }
   0xa   :  { %1003 = vmatprep.mubr.msk.f32.mxu0 %vm86_vm1, %v18_v9  ;;  %1051 = vmatprep.mubr.msk.f32.mxu1 %vm86_vm1, %v50_v10  ;;  %v58_v26 = vld [vmem:[%s1636_s0 + $0x160] sm:$0xff]  ;;  %v59_v28 = vld [vmem:[%s1636_s0 + $0x168] sm:$0xff]  ;;  %v28_v29 = vld [vmem:[%s1636_s0 + $0x70] sm:$0xff] }
   0xb   :  { %v60_v30 = vld [vmem:[%s1636_s0 + $0x170] sm:$0xff]  ;;  %v29_v31 = vld [vmem:[%s1636_s0 + $0x78] sm:$0xff]  ;;  %v30_v33 = vld [vmem:[%s1636_s0 + $0x80] sm:$0xff] }
   0xc   :  { %v61_v32 = vld [vmem:[%s1636_s0 + $0x178] sm:$0xff]  ;;  %v62_v34 = vld [vmem:[%s1636_s0 + $0x180] sm:$0xff]  ;;  %v31_v35 = vld [vmem:[%s1636_s0 + $0x88] sm:$0xff] }
   0xd   :  { %1004 = vmatmul.mubr.msk.f32.gmra.mxu0 %vm86_vm1, %v19_v11  ;;  %1052 = vmatmul.mubr.msk.f32.gmra.mxu1 %vm86_vm1, %v51_v12  ;;  %v63_v36 = vld [vmem:[%s1636_s0 + $0x188] sm:$0xff]  ;;  %v32_v37 = vld [vmem:[%s1636_s0 + $0x90] sm:$0xff]  ;;  %v33_v39 = vld [vmem:[%s1636_s0 + $0x98] sm:$0xff] }
   0xe   :  { %1006 = vmatprep.mubr.msk.f32.mxu0 %vm86_vm1, %v20_v13  ;;  %1054 = vmatprep.mubr.msk.f32.mxu1 %vm86_vm1, %v52_v14  ;;  %v64_v38 = vld [vmem:[%s1636_s0 + $0x190] sm:$0xff]  ;;  %v65_v40 = vld [vmem:[%s1636_s0 + $0x198] sm:$0xff]  ;;  %v34_v41 = vld [vmem:[%s1636_s0 + $0xa0] sm:$0xff] }
   0xf   :  { %v66_v42 = vld [vmem:[%s1636_s0 + $0x1a0] sm:$0xff]  ;;  %v35_v43 = vld [vmem:[%s1636_s0 + $0xa8] sm:$0xff]  ;;  %v36_v45 = vld [vmem:[%s1636_s0 + $0xb0] sm:$0xff] }
  0x10   :  { %v67_v44 = vld [vmem:[%s1636_s0 + $0x1a8] sm:$0xff]  ;;  %v68_v46 = vld [vmem:[%s1636_s0 + $0x1b0] sm:$0xff]  ;;  %v37_v47 = vld [vmem:[%s1636_s0 + $0xb8] sm:$0xff] }
  0x11   :  { %1007 = vmatmul.mubr.msk.f32.gmra.mxu0 %vm86_vm1, %v21_v15  ;;  %1055 = vmatmul.mubr.msk.f32.gmra.mxu1 %vm86_vm1, %v53_v16  ;;  %v69_v48 = vld [vmem:[%s1636_s0 + $0x1b8] sm:$0xff]  ;;  %v38_v49 = vld [vmem:[%s1636_s0 + $0xc0] sm:$0xff]  ;;  %v39_v51 = vld [vmem:[%s1636_s0 + $0xc8] sm:$0xff] }
  0x12   :  { %1009 = vmatprep.mubr.msk.f32.mxu0 %vm86_vm1, %v22_v17  ;;  %1057 = vmatprep.mubr.msk.f32.mxu1 %vm86_vm1, %v54_v18  ;;  %v70_v50 = vld [vmem:[%s1636_s0 + $0x1c0] sm:$0xff]  ;;  %v71_v52 = vld [vmem:[%s1636_s0 + $0x1c8] sm:$0xff]  ;;  %v40_v53 = vld [vmem:[%s1636_s0 + $0xd0] sm:$0xff] }
  0x13   :  { %v72_v54 = vld [vmem:[%s1636_s0 + $0x1d0] sm:$0xff]  ;;  %v41_v55 = vld [vmem:[%s1636_s0 + $0xd8] sm:$0xff]  ;;  %v42_v57 = vld [vmem:[%s1636_s0 + $0xe0] sm:$0xff] }
  0x14   :  { %v73_v56 = vld [vmem:[%s1636_s0 + $0x1d8] sm:$0xff]  ;;  %v74_v58 = vld [vmem:[%s1636_s0 + $0x1e0] sm:$0xff]  ;;  %v43_v59 = vld [vmem:[%s1636_s0 + $0xe8] sm:$0xff] }
  0x15   :  { %1010 = vmatmul.mubr.msk.f32.gmra.mxu0 %vm86_vm1, %v23_v19  ;;  %1058 = vmatmul.mubr.msk.f32.gmra.mxu1 %vm86_vm1, %v55_v20  ;;  %v75_v60 = vld [vmem:[%s1636_s0 + $0x1e8] sm:$0xff]  ;;  %v44_v61 = vld [vmem:[%s1636_s0 + $0xf0] sm:$0xff]  ;;  %v45_v63 = vld [vmem:[%s1636_s0 + $0xf8] sm:$0xff] }
  0x16   :  { %1012 = vmatprep.mubr.msk.f32.mxu0 %vm86_vm1, %v24_v21  ;;  %1060 = vmatprep.mubr.msk.f32.mxu1 %vm86_vm1, %v56_v22  ;;  %v76_v62 = vld [vmem:[%s1636_s0 + $0x1f0] sm:$0xff]  ;;  %v77_v0 = vld [vmem:[%s1636_s0 + $0x1f8] sm:$0xff]  ;;  %v1377_v1 = vld [vmem:[%s1637_s2] ss:$0 sm:$0xff] }
  0x19   :  { %1013 = vmatmul.mubr.msk.f32.gmra.mxu0 %vm86_vm1, %v25_v23  ;;  %1061 = vmatmul.mubr.msk.f32.gmra.mxu1 %vm86_vm1, %v57_v24 }
  0x1a   :  { %1015 = vmatprep.mubr.msk.f32.mxu0 %vm86_vm1, %v26_v25  ;;  %1063 = vmatprep.mubr.msk.f32.mxu1 %vm86_vm1, %v58_v26 }
  0x1d   :  { %1016 = vmatmul.mubr.msk.f32.gmra.mxu0 %vm86_vm1, %v27_v27  ;;  %1064 = vmatmul.mubr.msk.f32.gmra.mxu1 %vm86_vm1, %v59_v28 }
  0x1e   :  { %1018 = vmatprep.mubr.msk.f32.mxu0 %vm86_vm1, %v28_v29  ;;  %1066 = vmatprep.mubr.msk.f32.mxu1 %vm86_vm1, %v60_v30 }
  0x21   :  { %1019 = vmatmul.mubr.msk.f32.gmra.mxu0 %vm86_vm1, %v29_v31  ;;  %1067 = vmatmul.mubr.msk.f32.gmra.mxu1 %vm86_vm1, %v61_v32 }
  0x22   :  { %1021 = vmatprep.mubr.msk.f32.mxu0 %vm86_vm1, %v30_v33  ;;  %1069 = vmatprep.mubr.msk.f32.mxu1 %vm86_vm1, %v62_v34 }
  0x25   :  { %1022 = vmatmul.mubr.msk.f32.gmra.mxu0 %vm86_vm1, %v31_v35  ;;  %1070 = vmatmul.mubr.msk.f32.gmra.mxu1 %vm86_vm1, %v63_v36 }
  0x26   :  { %1024 = vmatprep.mubr.msk.f32.mxu0 %vm86_vm1, %v32_v37  ;;  %1072 = vmatprep.mubr.msk.f32.mxu1 %vm86_vm1, %v64_v38 }
  0x29   :  { %1025 = vmatmul.mubr.msk.f32.gmra.mxu0 %vm86_vm1, %v33_v39  ;;  %1073 = vmatmul.mubr.msk.f32.gmra.mxu1 %vm86_vm1, %v65_v40 }
  0x2a   :  { %1027 = vmatprep.mubr.msk.f32.mxu0 %vm86_vm1, %v34_v41  ;;  %1075 = vmatprep.mubr.msk.f32.mxu1 %vm86_vm1, %v66_v42 }
  0x2d   :  { %1028 = vmatmul.mubr.msk.f32.gmra.mxu0 %vm86_vm1, %v35_v43  ;;  %1076 = vmatmul.mubr.msk.f32.gmra.mxu1 %vm86_vm1, %v67_v44 }
  0x2e   :  { %1030 = vmatprep.mubr.msk.f32.mxu0 %vm86_vm1, %v36_v45  ;;  %1078 = vmatprep.mubr.msk.f32.mxu1 %vm86_vm1, %v68_v46 }
  0x31   :  { %1031 = vmatmul.mubr.msk.f32.gmra.mxu0 %vm86_vm1, %v37_v47  ;;  %1079 = vmatmul.mubr.msk.f32.gmra.mxu1 %vm86_vm1, %v69_v48 }
  0x32   :  { %1033 = vmatprep.mubr.msk.f32.mxu0 %vm86_vm1, %v38_v49  ;;  %1081 = vmatprep.mubr.msk.f32.mxu1 %vm86_vm1, %v70_v50 }
  0x35   :  { %1034 = vmatmul.mubr.msk.f32.gmra.mxu0 %vm86_vm1, %v39_v51  ;;  %1082 = vmatmul.mubr.msk.f32.gmra.mxu1 %vm86_vm1, %v71_v52 }
  0x36   :  { %1036 = vmatprep.mubr.msk.f32.mxu0 %vm86_vm1, %v40_v53  ;;  %1084 = vmatprep.mubr.msk.f32.mxu1 %vm86_vm1, %v72_v54 }
  0x39   :  { %1037 = vmatmul.mubr.msk.f32.gmra.mxu0 %vm86_vm1, %v41_v55  ;;  %1085 = vmatmul.mubr.msk.f32.gmra.mxu1 %vm86_vm1, %v73_v56 }
  0x3a   :  { %1039 = vmatprep.mubr.msk.f32.mxu0 %vm86_vm1, %v42_v57  ;;  %1087 = vmatprep.mubr.msk.f32.mxu1 %vm86_vm1, %v74_v58 }
  0x3d   :  { %1040 = vmatmul.mubr.msk.f32.gmra.mxu0 %vm86_vm1, %v43_v59  ;;  %1088 = vmatmul.mubr.msk.f32.gmra.mxu1 %vm86_vm1, %v75_v60 }
  0x3e   :  { %1042 = vmatprep.mubr.msk.f32.mxu0 %vm86_vm1, %v44_v61  ;;  %1090 = vmatprep.mubr.msk.f32.mxu1 %vm86_vm1, %v76_v62 }
  0x41   :  { %1043 = vmatmul.mubr.msk.f32.gmra.mxu0 %vm86_vm1, %v45_v63  ;;  %1091 = vmatmul.mubr.msk.f32.gmra.mxu1 %vm86_vm1, %v77_v0 }
  0xc5   :  { %v999_v2 = vpop.f32.mrf.mxu0  ;;  %v1047_v3 = vpop.f32.mrf.mxu1 }
  0xc6   :  { %v355_v4 = vadd.f32 %v999_v2, %v1377_v1  ;;  %v515_v5 = vadd.f32 %v1047_v3, %v1377_v1 }
  0xc7   :  { %v349_v6 = vpop.f32.mrf.mxu0  ;;  %v509_v7 = vpop.f32.mrf.mxu1 }
  0xc8   :  { %v669_v8 = vmax.f32 %v355_v4, 0.0  ;;  %v701_v9 = vmax.f32 %v515_v5, 0.0  ;;  %v350_v10 = vadd.f32 %v1377_v1, %v349_v6  ;;  %v510_v11 = vadd.f32 %v1377_v1, %v509_v7 }
  0xc9   :  { %v1002_v12 = vpop.f32.mrf.mxu0  ;;  %v1050_v13 = vpop.f32.mrf.mxu1 }
  0xca   :  { %v733_v14 = vmin.f32 %v669_v8, 6.0  ;;  %v765_v15 = vmin.f32 %v701_v9, 6.0  ;;  %v668_v16 = vmax.f32 %v350_v10, 0.0  ;;  %v700_v17 = vmax.f32 %v510_v11, 0.0 }
  0xcb   :  { %v365_v18 = vadd.f32 %v1002_v12, %v1377_v1  ;;  %v525_v19 = vadd.f32 %v1050_v13, %v1377_v1  ;;  %v359_v20 = vpop.f32.mrf.mxu0  ;;  %v519_v21 = vpop.f32.mrf.mxu1 }
  0xcc   :  { %797 = vst [vmem:[%s1638_s3 + $0x8] sm:$0xff] %v733_v14  ;;  %829 = vst [vmem:[%s1638_s3 + $0x108] sm:$0xff] %v765_v15  ;;  %v732_v22 = vmin.f32 %v668_v16, 6.0  ;;  %v764_v23 = vmin.f32 %v700_v17, 6.0  ;;  %v360_v24 = vadd.f32 %v1377_v1, %v359_v20  ;;  %v520_v25 = vadd.f32 %v1377_v1, %v519_v21 }
  0xcd   :  { %v671_v26 = vmax.f32 %v365_v18, 0.0  ;;  %v703_v27 = vmax.f32 %v525_v19, 0.0  ;;  %v1005_v28 = vpop.f32.mrf.mxu0  ;;  %v1053_v29 = vpop.f32.mrf.mxu1 }
  0xce   :  { %796 = vst [vmem:[%s1638_s3] sm:$0xff] %v732_v22  ;;  %828 = vst [vmem:[%s1638_s3 + $0x100] sm:$0xff] %v764_v23  ;;  %v670_v30 = vmax.f32 %v360_v24, 0.0  ;;  %v702_v31 = vmax.f32 %v520_v25, 0.0  ;;  %v375_v32 = vadd.f32 %v1005_v28, %v1377_v1  ;;  %v535_v33 = vadd.f32 %v1053_v29, %v1377_v1 }
  0xcf   :  { %v735_v34 = vmin.f32 %v671_v26, 6.0  ;;  %v767_v35 = vmin.f32 %v703_v27, 6.0  ;;  %v369_v36 = vpop.f32.mrf.mxu0  ;;  %v529_v37 = vpop.f32.mrf.mxu1 }
  0xd0   :  { %v734_v38 = vmin.f32 %v670_v30, 6.0  ;;  %v766_v39 = vmin.f32 %v702_v31, 6.0  ;;  %v673_v40 = vmax.f32 %v375_v32, 0.0  ;;  %v705_v41 = vmax.f32 %v535_v33, 0.0 }
  0xd1   :  { %799 = vst [vmem:[%s1638_s3 + $0x18] sm:$0xff] %v735_v34  ;;  %831 = vst [vmem:[%s1638_s3 + $0x118] sm:$0xff] %v767_v35  ;;  %v370_v42 = vadd.f32 %v1377_v1, %v369_v36  ;;  %v530_v43 = vadd.f32 %v1377_v1, %v529_v37  ;;  %v1008_v44 = vpop.f32.mrf.mxu0  ;;  %v1056_v45 = vpop.f32.mrf.mxu1 }
  0xd2   :  { %798 = vst [vmem:[%s1638_s3 + $0x10] sm:$0xff] %v734_v38  ;;  %830 = vst [vmem:[%s1638_s3 + $0x110] sm:$0xff] %v766_v39  ;;  %v737_v46 = vmin.f32 %v673_v40, 6.0  ;;  %v769_v47 = vmin.f32 %v705_v41, 6.0  ;;  %v385_v48 = vadd.f32 %v1008_v44, %v1377_v1  ;;  %v545_v49 = vadd.f32 %v1056_v45, %v1377_v1 }
  0xd3   :  { %v672_v50 = vmax.f32 %v370_v42, 0.0  ;;  %v704_v51 = vmax.f32 %v530_v43, 0.0  ;;  %v379_v52 = vpop.f32.mrf.mxu0  ;;  %v539_v53 = vpop.f32.mrf.mxu1 }
  0xd4   :  { %801 = vst [vmem:[%s1638_s3 + $0x28] sm:$0xff] %v737_v46  ;;  %833 = vst [vmem:[%s1638_s3 + $0x128] sm:$0xff] %v769_v47  ;;  %v675_v54 = vmax.f32 %v385_v48, 0.0  ;;  %v707_v55 = vmax.f32 %v545_v49, 0.0  ;;  %v380_v56 = vadd.f32 %v1377_v1, %v379_v52  ;;  %v540_v57 = vadd.f32 %v1377_v1, %v539_v53 }
  0xd5   :  { %v736_v58 = vmin.f32 %v672_v50, 6.0  ;;  %v768_v59 = vmin.f32 %v704_v51, 6.0  ;;  %v1011_v60 = vpop.f32.mrf.mxu0  ;;  %v1059_v61 = vpop.f32.mrf.mxu1 }
  0xd6   :  { %v739_v62 = vmin.f32 %v675_v54, 6.0  ;;  %v771_v63 = vmin.f32 %v707_v55, 6.0  ;;  %v674_v0 = vmax.f32 %v380_v56, 0.0  ;;  %v706_v2 = vmax.f32 %v540_v57, 0.0 }
  0xd7   :  { %800 = vst [vmem:[%s1638_s3 + $0x20] sm:$0xff] %v736_v58  ;;  %832 = vst [vmem:[%s1638_s3 + $0x120] sm:$0xff] %v768_v59  ;;  %v395_v3 = vadd.f32 %v1011_v60, %v1377_v1  ;;  %v555_v4 = vadd.f32 %v1059_v61, %v1377_v1  ;;  %v389_v5 = vpop.f32.mrf.mxu0  ;;  %v549_v6 = vpop.f32.mrf.mxu1 }
  0xd8   :  { %803 = vst [vmem:[%s1638_s3 + $0x38] sm:$0xff] %v739_v62  ;;  %835 = vst [vmem:[%s1638_s3 + $0x138] sm:$0xff] %v771_v63  ;;  %v738_v7 = vmin.f32 %v674_v0, 6.0  ;;  %v770_v8 = vmin.f32 %v706_v2, 6.0  ;;  %v390_v9 = vadd.f32 %v1377_v1, %v389_v5  ;;  %v550_v10 = vadd.f32 %v1377_v1, %v549_v6 }
  0xd9   :  { %v677_v11 = vmax.f32 %v395_v3, 0.0  ;;  %v709_v12 = vmax.f32 %v555_v4, 0.0  ;;  %v1014_v13 = vpop.f32.mrf.mxu0  ;;  %v1062_v14 = vpop.f32.mrf.mxu1 }
  0xda   :  { %802 = vst [vmem:[%s1638_s3 + $0x30] sm:$0xff] %v738_v7  ;;  %834 = vst [vmem:[%s1638_s3 + $0x130] sm:$0xff] %v770_v8  ;;  %v676_v15 = vmax.f32 %v390_v9, 0.0  ;;  %v708_v16 = vmax.f32 %v550_v10, 0.0  ;;  %v405_v17 = vadd.f32 %v1014_v13, %v1377_v1  ;;  %v565_v18 = vadd.f32 %v1062_v14, %v1377_v1 }
  0xdb   :  { %v741_v19 = vmin.f32 %v677_v11, 6.0  ;;  %v773_v20 = vmin.f32 %v709_v12, 6.0  ;;  %v399_v21 = vpop.f32.mrf.mxu0  ;;  %v559_v22 = vpop.f32.mrf.mxu1 }
  0xdc   :  { %v740_v23 = vmin.f32 %v676_v15, 6.0  ;;  %v772_v24 = vmin.f32 %v708_v16, 6.0  ;;  %v679_v25 = vmax.f32 %v405_v17, 0.0  ;;  %v711_v26 = vmax.f32 %v565_v18, 0.0 }
  0xdd   :  { %805 = vst [vmem:[%s1638_s3 + $0x48] sm:$0xff] %v741_v19  ;;  %837 = vst [vmem:[%s1638_s3 + $0x148] sm:$0xff] %v773_v20  ;;  %v400_v27 = vadd.f32 %v1377_v1, %v399_v21  ;;  %v560_v28 = vadd.f32 %v1377_v1, %v559_v22  ;;  %v1017_v29 = vpop.f32.mrf.mxu0  ;;  %v1065_v30 = vpop.f32.mrf.mxu1 }
  0xde   :  { %804 = vst [vmem:[%s1638_s3 + $0x40] sm:$0xff] %v740_v23  ;;  %836 = vst [vmem:[%s1638_s3 + $0x140] sm:$0xff] %v772_v24  ;;  %v743_v31 = vmin.f32 %v679_v25, 6.0  ;;  %v775_v32 = vmin.f32 %v711_v26, 6.0  ;;  %v415_v33 = vadd.f32 %v1017_v29, %v1377_v1  ;;  %v575_v34 = vadd.f32 %v1065_v30, %v1377_v1 }
  0xdf   :  { %v678_v35 = vmax.f32 %v400_v27, 0.0  ;;  %v710_v36 = vmax.f32 %v560_v28, 0.0  ;;  %v409_v37 = vpop.f32.mrf.mxu0  ;;  %v569_v38 = vpop.f32.mrf.mxu1 }
  0xe0   :  { %807 = vst [vmem:[%s1638_s3 + $0x58] sm:$0xff] %v743_v31  ;;  %839 = vst [vmem:[%s1638_s3 + $0x158] sm:$0xff] %v775_v32  ;;  %v681_v39 = vmax.f32 %v415_v33, 0.0  ;;  %v713_v40 = vmax.f32 %v575_v34, 0.0  ;;  %v410_v41 = vadd.f32 %v1377_v1, %v409_v37  ;;  %v570_v42 = vadd.f32 %v1377_v1, %v569_v38 }
  0xe1   :  { %v742_v43 = vmin.f32 %v678_v35, 6.0  ;;  %v774_v44 = vmin.f32 %v710_v36, 6.0  ;;  %v1020_v45 = vpop.f32.mrf.mxu0  ;;  %v1068_v46 = vpop.f32.mrf.mxu1 }
  0xe2   :  { %v745_v47 = vmin.f32 %v681_v39, 6.0  ;;  %v777_v48 = vmin.f32 %v713_v40, 6.0  ;;  %v680_v49 = vmax.f32 %v410_v41, 0.0  ;;  %v712_v50 = vmax.f32 %v570_v42, 0.0 }
  0xe3   :  { %806 = vst [vmem:[%s1638_s3 + $0x50] sm:$0xff] %v742_v43  ;;  %838 = vst [vmem:[%s1638_s3 + $0x150] sm:$0xff] %v774_v44  ;;  %v425_v51 = vadd.f32 %v1020_v45, %v1377_v1  ;;  %v585_v52 = vadd.f32 %v1068_v46, %v1377_v1  ;;  %v419_v53 = vpop.f32.mrf.mxu0  ;;  %v579_v54 = vpop.f32.mrf.mxu1 }
  0xe4   :  { %809 = vst [vmem:[%s1638_s3 + $0x68] sm:$0xff] %v745_v47  ;;  %841 = vst [vmem:[%s1638_s3 + $0x168] sm:$0xff] %v777_v48  ;;  %v744_v55 = vmin.f32 %v680_v49, 6.0  ;;  %v776_v56 = vmin.f32 %v712_v50, 6.0  ;;  %v420_v57 = vadd.f32 %v1377_v1, %v419_v53  ;;  %v580_v58 = vadd.f32 %v1377_v1, %v579_v54 }
  0xe5   :  { %v683_v59 = vmax.f32 %v425_v51, 0.0  ;;  %v715_v60 = vmax.f32 %v585_v52, 0.0  ;;  %v1023_v61 = vpop.f32.mrf.mxu0  ;;  %v1071_v62 = vpop.f32.mrf.mxu1 }
  0xe6   :  { %808 = vst [vmem:[%s1638_s3 + $0x60] sm:$0xff] %v744_v55  ;;  %840 = vst [vmem:[%s1638_s3 + $0x160] sm:$0xff] %v776_v56  ;;  %v682_v63 = vmax.f32 %v420_v57, 0.0  ;;  %v714_v0 = vmax.f32 %v580_v58, 0.0  ;;  %v435_v2 = vadd.f32 %v1023_v61, %v1377_v1  ;;  %v595_v3 = vadd.f32 %v1071_v62, %v1377_v1 }
  0xe7   :  { %v747_v4 = vmin.f32 %v683_v59, 6.0  ;;  %v779_v5 = vmin.f32 %v715_v60, 6.0  ;;  %v429_v6 = vpop.f32.mrf.mxu0  ;;  %v589_v7 = vpop.f32.mrf.mxu1 }
  0xe8   :  { %v746_v8 = vmin.f32 %v682_v63, 6.0  ;;  %v778_v9 = vmin.f32 %v714_v0, 6.0  ;;  %v685_v10 = vmax.f32 %v435_v2, 0.0  ;;  %v717_v11 = vmax.f32 %v595_v3, 0.0 }
  0xe9   :  { %811 = vst [vmem:[%s1638_s3 + $0x78] sm:$0xff] %v747_v4  ;;  %843 = vst [vmem:[%s1638_s3 + $0x178] sm:$0xff] %v779_v5  ;;  %v430_v12 = vadd.f32 %v1377_v1, %v429_v6  ;;  %v590_v13 = vadd.f32 %v1377_v1, %v589_v7  ;;  %v1026_v14 = vpop.f32.mrf.mxu0  ;;  %v1074_v15 = vpop.f32.mrf.mxu1 }
  0xea   :  { %810 = vst [vmem:[%s1638_s3 + $0x70] sm:$0xff] %v746_v8  ;;  %842 = vst [vmem:[%s1638_s3 + $0x170] sm:$0xff] %v778_v9  ;;  %v749_v16 = vmin.f32 %v685_v10, 6.0  ;;  %v781_v17 = vmin.f32 %v717_v11, 6.0  ;;  %v445_v18 = vadd.f32 %v1026_v14, %v1377_v1  ;;  %v605_v19 = vadd.f32 %v1074_v15, %v1377_v1 }
  0xeb   :  { %v684_v20 = vmax.f32 %v430_v12, 0.0  ;;  %v716_v21 = vmax.f32 %v590_v13, 0.0  ;;  %v439_v22 = vpop.f32.mrf.mxu0  ;;  %v599_v23 = vpop.f32.mrf.mxu1 }
  0xec   :  { %813 = vst [vmem:[%s1638_s3 + $0x88] sm:$0xff] %v749_v16  ;;  %845 = vst [vmem:[%s1638_s3 + $0x188] sm:$0xff] %v781_v17  ;;  %v687_v24 = vmax.f32 %v445_v18, 0.0  ;;  %v719_v25 = vmax.f32 %v605_v19, 0.0  ;;  %v440_v26 = vadd.f32 %v1377_v1, %v439_v22  ;;  %v600_v27 = vadd.f32 %v1377_v1, %v599_v23 }
  0xed   :  { %v748_v28 = vmin.f32 %v684_v20, 6.0  ;;  %v780_v29 = vmin.f32 %v716_v21, 6.0  ;;  %v1029_v30 = vpop.f32.mrf.mxu0  ;;  %v1077_v31 = vpop.f32.mrf.mxu1 }
  0xee   :  { %v751_v32 = vmin.f32 %v687_v24, 6.0  ;;  %v783_v33 = vmin.f32 %v719_v25, 6.0  ;;  %v686_v34 = vmax.f32 %v440_v26, 0.0  ;;  %v718_v35 = vmax.f32 %v600_v27, 0.0 }
  0xef   :  { %812 = vst [vmem:[%s1638_s3 + $0x80] sm:$0xff] %v748_v28  ;;  %844 = vst [vmem:[%s1638_s3 + $0x180] sm:$0xff] %v780_v29  ;;  %v455_v36 = vadd.f32 %v1029_v30, %v1377_v1  ;;  %v615_v37 = vadd.f32 %v1077_v31, %v1377_v1  ;;  %v449_v38 = vpop.f32.mrf.mxu0  ;;  %v609_v39 = vpop.f32.mrf.mxu1 }
  0xf0   :  { %815 = vst [vmem:[%s1638_s3 + $0x98] sm:$0xff] %v751_v32  ;;  %847 = vst [vmem:[%s1638_s3 + $0x198] sm:$0xff] %v783_v33  ;;  %v750_v40 = vmin.f32 %v686_v34, 6.0  ;;  %v782_v41 = vmin.f32 %v718_v35, 6.0  ;;  %v450_v42 = vadd.f32 %v1377_v1, %v449_v38  ;;  %v610_v43 = vadd.f32 %v1377_v1, %v609_v39 }
  0xf1   :  { %v689_v44 = vmax.f32 %v455_v36, 0.0  ;;  %v721_v45 = vmax.f32 %v615_v37, 0.0  ;;  %v1032_v46 = vpop.f32.mrf.mxu0  ;;  %v1080_v47 = vpop.f32.mrf.mxu1 }
  0xf2   :  { %814 = vst [vmem:[%s1638_s3 + $0x90] sm:$0xff] %v750_v40  ;;  %846 = vst [vmem:[%s1638_s3 + $0x190] sm:$0xff] %v782_v41  ;;  %v688_v48 = vmax.f32 %v450_v42, 0.0  ;;  %v720_v49 = vmax.f32 %v610_v43, 0.0  ;;  %v465_v50 = vadd.f32 %v1032_v46, %v1377_v1  ;;  %v625_v51 = vadd.f32 %v1080_v47, %v1377_v1 }
  0xf3   :  { %v753_v52 = vmin.f32 %v689_v44, 6.0  ;;  %v785_v53 = vmin.f32 %v721_v45, 6.0  ;;  %v459_v54 = vpop.f32.mrf.mxu0  ;;  %v619_v55 = vpop.f32.mrf.mxu1 }
  0xf4   :  { %v752_v56 = vmin.f32 %v688_v48, 6.0  ;;  %v784_v57 = vmin.f32 %v720_v49, 6.0  ;;  %v691_v58 = vmax.f32 %v465_v50, 0.0  ;;  %v723_v59 = vmax.f32 %v625_v51, 0.0 }
  0xf5   :  { %817 = vst [vmem:[%s1638_s3 + $0xa8] sm:$0xff] %v753_v52  ;;  %849 = vst [vmem:[%s1638_s3 + $0x1a8] sm:$0xff] %v785_v53  ;;  %v460_v60 = vadd.f32 %v1377_v1, %v459_v54  ;;  %v620_v61 = vadd.f32 %v1377_v1, %v619_v55  ;;  %v1035_v62 = vpop.f32.mrf.mxu0  ;;  %v1083_v63 = vpop.f32.mrf.mxu1 }
  0xf6   :  { %816 = vst [vmem:[%s1638_s3 + $0xa0] sm:$0xff] %v752_v56  ;;  %848 = vst [vmem:[%s1638_s3 + $0x1a0] sm:$0xff] %v784_v57  ;;  %v755_v0 = vmin.f32 %v691_v58, 6.0  ;;  %v787_v2 = vmin.f32 %v723_v59, 6.0  ;;  %v475_v3 = vadd.f32 %v1035_v62, %v1377_v1  ;;  %v635_v4 = vadd.f32 %v1083_v63, %v1377_v1 }
  0xf7   :  { %v690_v5 = vmax.f32 %v460_v60, 0.0  ;;  %v722_v6 = vmax.f32 %v620_v61, 0.0  ;;  %v469_v7 = vpop.f32.mrf.mxu0  ;;  %v629_v8 = vpop.f32.mrf.mxu1 }
  0xf8   :  { %819 = vst [vmem:[%s1638_s3 + $0xb8] sm:$0xff] %v755_v0  ;;  %851 = vst [vmem:[%s1638_s3 + $0x1b8] sm:$0xff] %v787_v2  ;;  %v693_v9 = vmax.f32 %v475_v3, 0.0  ;;  %v725_v10 = vmax.f32 %v635_v4, 0.0  ;;  %v470_v11 = vadd.f32 %v1377_v1, %v469_v7  ;;  %v630_v12 = vadd.f32 %v1377_v1, %v629_v8 }
  0xf9   :  { %v754_v13 = vmin.f32 %v690_v5, 6.0  ;;  %v786_v14 = vmin.f32 %v722_v6, 6.0  ;;  %v1038_v15 = vpop.f32.mrf.mxu0  ;;  %v1086_v16 = vpop.f32.mrf.mxu1 }
  0xfa   :  { %v757_v17 = vmin.f32 %v693_v9, 6.0  ;;  %v789_v18 = vmin.f32 %v725_v10, 6.0  ;;  %v692_v19 = vmax.f32 %v470_v11, 0.0  ;;  %v724_v20 = vmax.f32 %v630_v12, 0.0 }
  0xfb   :  { %818 = vst [vmem:[%s1638_s3 + $0xb0] sm:$0xff] %v754_v13  ;;  %850 = vst [vmem:[%s1638_s3 + $0x1b0] sm:$0xff] %v786_v14  ;;  %v485_v21 = vadd.f32 %v1038_v15, %v1377_v1  ;;  %v645_v22 = vadd.f32 %v1086_v16, %v1377_v1  ;;  %v479_v23 = vpop.f32.mrf.mxu0  ;;  %v639_v24 = vpop.f32.mrf.mxu1 }
  0xfc   :  { %821 = vst [vmem:[%s1638_s3 + $0xc8] sm:$0xff] %v757_v17  ;;  %853 = vst [vmem:[%s1638_s3 + $0x1c8] sm:$0xff] %v789_v18  ;;  %v756_v25 = vmin.f32 %v692_v19, 6.0  ;;  %v788_v26 = vmin.f32 %v724_v20, 6.0  ;;  %v480_v27 = vadd.f32 %v1377_v1, %v479_v23  ;;  %v640_v28 = vadd.f32 %v1377_v1, %v639_v24 }
  0xfd   :  { %v695_v29 = vmax.f32 %v485_v21, 0.0  ;;  %v727_v30 = vmax.f32 %v645_v22, 0.0  ;;  %v1041_v31 = vpop.f32.mrf.mxu0  ;;  %v1089_v32 = vpop.f32.mrf.mxu1 }
  0xfe   :  { %820 = vst [vmem:[%s1638_s3 + $0xc0] sm:$0xff] %v756_v25  ;;  %852 = vst [vmem:[%s1638_s3 + $0x1c0] sm:$0xff] %v788_v26  ;;  %v694_v33 = vmax.f32 %v480_v27, 0.0  ;;  %v726_v34 = vmax.f32 %v640_v28, 0.0  ;;  %v495_v35 = vadd.f32 %v1041_v31, %v1377_v1  ;;  %v655_v36 = vadd.f32 %v1089_v32, %v1377_v1 }
  0xff   :  { %v759_v37 = vmin.f32 %v695_v29, 6.0  ;;  %v791_v38 = vmin.f32 %v727_v30, 6.0  ;;  %v489_v39 = vpop.f32.mrf.mxu0  ;;  %v649_v40 = vpop.f32.mrf.mxu1 }
 0x100   :  { %v758_v41 = vmin.f32 %v694_v33, 6.0  ;;  %v790_v42 = vmin.f32 %v726_v34, 6.0  ;;  %v697_v43 = vmax.f32 %v495_v35, 0.0  ;;  %v729_v44 = vmax.f32 %v655_v36, 0.0 }
 0x101   :  { %823 = vst [vmem:[%s1638_s3 + $0xd8] sm:$0xff] %v759_v37  ;;  %855 = vst [vmem:[%s1638_s3 + $0x1d8] sm:$0xff] %v791_v38  ;;  %v490_v45 = vadd.f32 %v1377_v1, %v489_v39  ;;  %v650_v46 = vadd.f32 %v1377_v1, %v649_v40  ;;  %v1044_v47 = vpop.f32.mrf.mxu0  ;;  %v1092_v48 = vpop.f32.mrf.mxu1 }
 0x102   :  { %822 = vst [vmem:[%s1638_s3 + $0xd0] sm:$0xff] %v758_v41  ;;  %854 = vst [vmem:[%s1638_s3 + $0x1d0] sm:$0xff] %v790_v42  ;;  %v761_v49 = vmin.f32 %v697_v43, 6.0  ;;  %v793_v50 = vmin.f32 %v729_v44, 6.0  ;;  %v505_v51 = vadd.f32 %v1044_v47, %v1377_v1  ;;  %v665_v52 = vadd.f32 %v1092_v48, %v1377_v1 }
 0x103   :  { %v696_v53 = vmax.f32 %v490_v45, 0.0  ;;  %v728_v54 = vmax.f32 %v650_v46, 0.0  ;;  %v499_v55 = vpop.f32.mrf.mxu0  ;;  %v659_v56 = vpop.f32.mrf.mxu1 }
 0x104   :  { %825 = vst [vmem:[%s1638_s3 + $0xe8] sm:$0xff] %v761_v49  ;;  %857 = vst [vmem:[%s1638_s3 + $0x1e8] sm:$0xff] %v793_v50  ;;  %v699_v57 = vmax.f32 %v505_v51, 0.0  ;;  %v731_v58 = vmax.f32 %v665_v52, 0.0  ;;  %v500_v59 = vadd.f32 %v1377_v1, %v499_v55  ;;  %v660_v60 = vadd.f32 %v1377_v1, %v659_v56 }
 0x105   :  { %v760_v61 = vmin.f32 %v696_v53, 6.0  ;;  %v792_v62 = vmin.f32 %v728_v54, 6.0 }
 0x106   :  { %v763_v63 = vmin.f32 %v699_v57, 6.0  ;;  %v795_v0 = vmin.f32 %v731_v58, 6.0  ;;  %v698_v2 = vmax.f32 %v500_v59, 0.0  ;;  %v730_v3 = vmax.f32 %v660_v60, 0.0 }
 0x107   :  { %824 = vst [vmem:[%s1638_s3 + $0xe0] sm:$0xff] %v760_v61  ;;  %856 = vst [vmem:[%s1638_s3 + $0x1e0] sm:$0xff] %v792_v62 }
 0x108   :  { %827 = vst [vmem:[%s1638_s3 + $0xf8] sm:$0xff] %v763_v63  ;;  %859 = vst [vmem:[%s1638_s3 + $0x1f8] sm:$0xff] %v795_v0  ;;  %v762_v1 = vmin.f32 %v698_v2, 6.0  ;;  %v794_v4 = vmin.f32 %v730_v3, 6.0 }
 0x10a   :  { %826 = vst [vmem:[%s1638_s3 + $0xf0] sm:$0xff] %v762_v1  ;;  %858 = vst [vmem:[%s1638_s3 + $0x1f0] sm:$0xff] %v794_v4 }

// kernel: block_for_stride_two_forward.3
= control target key start
LH: loop header
LB: loop body
LE: loop exit
PB: predicated region body
PF: predicated region fallthrough
CT: control target
= control target key end

     0   :  { %s2988_s1 = inlined_call_operand.vmem [shape: f32[1152,128], index: 1, kind: input, shape index: {}]   ;;  %s2989_s0 = inlined_call_operand.vmem [shape: f32[128,1152], index: 0, kind: input, shape index: {}]   ;;  %s2990_s3 = inlined_call_operand.vmem [shape: f32[128,128], index: 3, kind: input, shape index: {}]   ;;  %s2991_s2 = inlined_call_operand.vmem [shape: f32[1,128], index: 2, kind: input, shape index: {}]   ;;  %s2992_s4 = inlined_call_operand.vmem [shape: f32[1,128], index: 4, kind: input, shape index: {}]   ;;  %s2993_s5 = inlined_call_operand.vmem [shape: f32[128,128], index: 5, kind: output, shape index: {}]  }
   0x1   :  { %v195_v0 = vld [vmem:[%s2988_s1 + $0xf8] sm:$0xff]  ;;  %v194_v2 = vld [vmem:[%s2988_s1 + $0xf0] sm:$0xff]  ;;  %v193_v6 = vld [vmem:[%s2988_s1 + $0xe8] sm:$0xff] }
   0x2   :  { %v179_v1 = vld [vmem:[%s2988_s1 + $0x78] sm:$0xff]  ;;  %1294 = vmatprep.subr.mxu0 %v195_v0  ;;  %v178_v4 = vld [vmem:[%s2988_s1 + $0x70] sm:$0xff]  ;;  %v177_v8 = vld [vmem:[%s2988_s1 + $0x68] sm:$0xff] }
   0x3   :  { %v227_v3 = vld [vmem:[%s2988_s1 + $0x1f8] sm:$0xff]  ;;  %1295 = vmatpush3.msra.mxu0 %v179_v1  ;;  %v226_v7 = vld [vmem:[%s2988_s1 + $0x1f0] sm:$0xff]  ;;  %v225_v10 = vld [vmem:[%s2988_s1 + $0x1e8] sm:$0xff] }
   0x4   :  { %v211_v5 = vld [vmem:[%s2988_s1 + $0x178] sm:$0xff]  ;;  %1374 = vmatprep.subr.mxu1 %v227_v3  ;;  %1296 = vmatprep.subr.mxu0 %v194_v2  ;;  %v210_v9 = vld [vmem:[%s2988_s1 + $0x170] sm:$0xff]  ;;  %v192_v11 = vld [vmem:[%s2988_s1 + $0xe0] sm:$0xff] }
   0x5   :  { %1375 = vmatpush3.msra.mxu1 %v211_v5  ;;  %1297 = vmatpush3.msra.mxu0 %v178_v4  ;;  %v209_v12 = vld [vmem:[%s2988_s1 + $0x168] sm:$0xff]  ;;  %v176_v13 = vld [vmem:[%s2988_s1 + $0x60] sm:$0xff]  ;;  %v191_v15 = vld [vmem:[%s2988_s1 + $0xd8] sm:$0xff] }
   0x6   :  { %1376 = vmatprep.subr.mxu1 %v226_v7  ;;  %1298 = vmatprep.subr.mxu0 %v193_v6  ;;  %v224_v14 = vld [vmem:[%s2988_s1 + $0x1e0] sm:$0xff]  ;;  %v175_v17 = vld [vmem:[%s2988_s1 + $0x58] sm:$0xff]  ;;  %v190_v19 = vld [vmem:[%s2988_s1 + $0xd0] sm:$0xff] }
   0x7   :  { %1377 = vmatpush3.msra.mxu1 %v210_v9  ;;  %1299 = vmatpush3.msra.mxu0 %v177_v8  ;;  %v208_v16 = vld [vmem:[%s2988_s1 + $0x160] sm:$0xff]  ;;  %v223_v18 = vld [vmem:[%s2988_s1 + $0x1d8] sm:$0xff]  ;;  %v174_v21 = vld [vmem:[%s2988_s1 + $0x50] sm:$0xff] }
   0x8   :  { %1378 = vmatprep.subr.mxu1 %v225_v10  ;;  %1300 = vmatprep.subr.mxu0 %v192_v11  ;;  %v207_v20 = vld [vmem:[%s2988_s1 + $0x158] sm:$0xff]  ;;  %v222_v22 = vld [vmem:[%s2988_s1 + $0x1d0] sm:$0xff]  ;;  %v189_v23 = vld [vmem:[%s2988_s1 + $0xc8] sm:$0xff] }
   0x9   :  { %1379 = vmatpush3.msra.mxu1 %v209_v12  ;;  %1301 = vmatpush3.msra.mxu0 %v176_v13  ;;  %v206_v24 = vld [vmem:[%s2988_s1 + $0x150] sm:$0xff]  ;;  %v173_v25 = vld [vmem:[%s2988_s1 + $0x48] sm:$0xff]  ;;  %v188_v27 = vld [vmem:[%s2988_s1 + $0xc0] sm:$0xff] }
   0xa   :  { %1380 = vmatprep.subr.mxu1 %v224_v14  ;;  %1302 = vmatprep.subr.mxu0 %v191_v15  ;;  %v221_v26 = vld [vmem:[%s2988_s1 + $0x1c8] sm:$0xff]  ;;  %v172_v29 = vld [vmem:[%s2988_s1 + $0x40] sm:$0xff]  ;;  %v187_v31 = vld [vmem:[%s2988_s1 + $0xb8] sm:$0xff] }
   0xb   :  { %1381 = vmatpush3.msra.mxu1 %v208_v16  ;;  %1303 = vmatpush3.msra.mxu0 %v175_v17  ;;  %v205_v28 = vld [vmem:[%s2988_s1 + $0x148] sm:$0xff]  ;;  %v220_v30 = vld [vmem:[%s2988_s1 + $0x1c0] sm:$0xff]  ;;  %v171_v33 = vld [vmem:[%s2988_s1 + $0x38] sm:$0xff] }
   0xc   :  { %1382 = vmatprep.subr.mxu1 %v223_v18  ;;  %1304 = vmatprep.subr.mxu0 %v190_v19  ;;  %v204_v32 = vld [vmem:[%s2988_s1 + $0x140] sm:$0xff]  ;;  %v219_v34 = vld [vmem:[%s2988_s1 + $0x1b8] sm:$0xff]  ;;  %v186_v35 = vld [vmem:[%s2988_s1 + $0xb0] sm:$0xff] }
   0xd   :  { %1383 = vmatpush3.msra.mxu1 %v207_v20  ;;  %1305 = vmatpush3.msra.mxu0 %v174_v21  ;;  %v203_v36 = vld [vmem:[%s2988_s1 + $0x138] sm:$0xff]  ;;  %v170_v37 = vld [vmem:[%s2988_s1 + $0x30] sm:$0xff]  ;;  %v185_v39 = vld [vmem:[%s2988_s1 + $0xa8] sm:$0xff] }
   0xe   :  { %1384 = vmatprep.subr.mxu1 %v222_v22  ;;  %1306 = vmatprep.subr.mxu0 %v189_v23  ;;  %v218_v38 = vld [vmem:[%s2988_s1 + $0x1b0] sm:$0xff]  ;;  %v169_v41 = vld [vmem:[%s2988_s1 + $0x28] sm:$0xff]  ;;  %v184_v43 = vld [vmem:[%s2988_s1 + $0xa0] sm:$0xff] }
   0xf   :  { %1385 = vmatpush3.msra.mxu1 %v206_v24  ;;  %1307 = vmatpush3.msra.mxu0 %v173_v25  ;;  %v202_v40 = vld [vmem:[%s2988_s1 + $0x130] sm:$0xff]  ;;  %v217_v42 = vld [vmem:[%s2988_s1 + $0x1a8] sm:$0xff]  ;;  %v168_v45 = vld [vmem:[%s2988_s1 + $0x20] sm:$0xff] }
  0x10   :  { %1386 = vmatprep.subr.mxu1 %v221_v26  ;;  %1308 = vmatprep.subr.mxu0 %v188_v27  ;;  %v201_v44 = vld [vmem:[%s2988_s1 + $0x128] sm:$0xff]  ;;  %v216_v46 = vld [vmem:[%s2988_s1 + $0x1a0] sm:$0xff]  ;;  %v183_v47 = vld [vmem:[%s2988_s1 + $0x98] sm:$0xff] }
  0x11   :  { %1387 = vmatpush3.msra.mxu1 %v205_v28  ;;  %1309 = vmatpush3.msra.mxu0 %v172_v29  ;;  %v200_v48 = vld [vmem:[%s2988_s1 + $0x120] sm:$0xff]  ;;  %v167_v49 = vld [vmem:[%s2988_s1 + $0x18] sm:$0xff]  ;;  %v182_v51 = vld [vmem:[%s2988_s1 + $0x90] sm:$0xff] }
  0x12   :  { %1388 = vmatprep.subr.mxu1 %v220_v30  ;;  %1310 = vmatprep.subr.mxu0 %v187_v31  ;;  %v215_v50 = vld [vmem:[%s2988_s1 + $0x198] sm:$0xff]  ;;  %v166_v53 = vld [vmem:[%s2988_s1 + $0x10] sm:$0xff]  ;;  %v181_v55 = vld [vmem:[%s2988_s1 + $0x88] sm:$0xff] }
  0x13   :  { %1389 = vmatpush3.msra.mxu1 %v204_v32  ;;  %1311 = vmatpush3.msra.mxu0 %v171_v33  ;;  %v199_v52 = vld [vmem:[%s2988_s1 + $0x118] sm:$0xff]  ;;  %v214_v54 = vld [vmem:[%s2988_s1 + $0x190] sm:$0xff]  ;;  %v165_v57 = vld [vmem:[%s2988_s1 + $0x8] sm:$0xff] }
  0x14   :  { %1390 = vmatprep.subr.mxu1 %v219_v34  ;;  %1312 = vmatprep.subr.mxu0 %v186_v35  ;;  %v198_v56 = vld [vmem:[%s2988_s1 + $0x110] sm:$0xff]  ;;  %v213_v58 = vld [vmem:[%s2988_s1 + $0x188] sm:$0xff]  ;;  %v180_v59 = vld [vmem:[%s2988_s1 + $0x80] sm:$0xff] }
  0x15   :  { %1391 = vmatpush3.msra.mxu1 %v203_v36  ;;  %1313 = vmatpush3.msra.mxu0 %v170_v37  ;;  %v21_v60 = vld [vmem:[%s2989_s0 + $0x8] sm:$0xff]  ;;  %v164_v61 = vld [vmem:[%s2988_s1] sm:$0xff]  ;;  %v259_v1 = vld [vmem:[%s2988_s1 + $0x2f8] sm:$0xff] }
  0x16   :  { %1392 = vmatprep.subr.mxu1 %v218_v38  ;;  %1314 = vmatprep.subr.mxu0 %v185_v39  ;;  %v197_v62 = vld [vmem:[%s2988_s1 + $0x108] sm:$0xff]  ;;  %v20_v63 = vld [vmem:[%s2989_s0] sm:$0xff]  ;;  %v23_v3 = vld [vmem:[%s2989_s0 + $0x18] sm:$0xff] }
  0x17   :  { %1393 = vmatpush3.msra.mxu1 %v202_v40  ;;  %1315 = vmatpush3.msra.mxu0 %v169_v41  ;;  %v212_v0 = vld [vmem:[%s2988_s1 + $0x180] sm:$0xff]  ;;  %v243_v4 = vld [vmem:[%s2988_s1 + $0x278] sm:$0xff]  ;;  %v22_v5 = vld [vmem:[%s2989_s0 + $0x10] sm:$0xff] }
  0x18   :  { %1394 = vmatprep.subr.mxu1 %v217_v42  ;;  %1316 = vmatprep.subr.mxu0 %v184_v43  ;;  %v196_v2 = vld [vmem:[%s2988_s1 + $0x100] sm:$0xff]  ;;  %v30_v6 = vld [vmem:[%s2989_s0 + $0x50] sm:$0xff]  ;;  %v29_v7 = vld [vmem:[%s2989_s0 + $0x48] sm:$0xff] }
  0x19   :  { %1395 = vmatpush3.msra.mxu1 %v201_v44  ;;  %1317 = vmatpush3.msra.mxu0 %v168_v45  ;;  %v258_v8 = vld [vmem:[%s2988_s1 + $0x2f0] sm:$0xff]  ;;  %v32_v9 = vld [vmem:[%s2989_s0 + $0x60] sm:$0xff]  ;;  %v39_v11 = vld [vmem:[%s2989_s0 + $0x98] sm:$0xff] }
  0x1a   :  { %1396 = vmatprep.subr.mxu1 %v216_v46  ;;  %1318 = vmatprep.subr.mxu0 %v183_v47  ;;  %v242_v10 = vld [vmem:[%s2988_s1 + $0x270] sm:$0xff]  ;;  %v257_v12 = vld [vmem:[%s2988_s1 + $0x2e8] sm:$0xff]  ;;  %v31_v13 = vld [vmem:[%s2989_s0 + $0x58] sm:$0xff] }
  0x1b   :  { %1397 = vmatpush3.msra.mxu1 %v200_v48  ;;  %1319 = vmatpush3.msra.mxu0 %v167_v49  ;;  %v241_v14 = vld [vmem:[%s2988_s1 + $0x268] sm:$0xff]  ;;  %v38_v15 = vld [vmem:[%s2989_s0 + $0x90] sm:$0xff]  ;;  %v48_v17 = vld [vmem:[%s2989_s0 + $0xe0] sm:$0xff] }
  0x1c   :  { %1398 = vmatprep.subr.mxu1 %v215_v50  ;;  %1320 = vmatprep.subr.mxu0 %v182_v51  ;;  %v41_v16 = vld [vmem:[%s2989_s0 + $0xa8] sm:$0xff]  ;;  %v256_v18 = vld [vmem:[%s2988_s1 + $0x2e0] sm:$0xff]  ;;  %v291_v20 = vld [vmem:[%s2988_s1 + $0x3f8] sm:$0xff] }
  0x1d   :  { %1399 = vmatpush3.msra.mxu1 %v199_v52  ;;  %1321 = vmatpush3.msra.mxu0 %v166_v53  ;;  %v240_v19 = vld [vmem:[%s2988_s1 + $0x260] sm:$0xff]  ;;  %v255_v22 = vld [vmem:[%s2988_s1 + $0x2d8] sm:$0xff]  ;;  %v50_v24 = vld [vmem:[%s2989_s0 + $0xf0] sm:$0xff] }
  0x1e   :  { %1400 = vmatprep.subr.mxu1 %v214_v54  ;;  %1322 = vmatprep.subr.mxu0 %v181_v55  ;;  %v40_v21 = vld [vmem:[%s2989_s0 + $0xa0] sm:$0xff]  ;;  %v47_v23 = vld [vmem:[%s2989_s0 + $0xd8] sm:$0xff]  ;;  %v57_v25 = vld [vmem:[%s2989_s0 + $0x128] sm:$0xff] }
  0x1f   :  { %1401 = vmatpush3.msra.mxu1 %v198_v56  ;;  %1323 = vmatpush3.msra.mxu0 %v165_v57  ;;  %v239_v26 = vld [vmem:[%s2988_s1 + $0x258] sm:$0xff]  ;;  %v254_v27 = vld [vmem:[%s2988_s1 + $0x2d0] sm:$0xff]  ;;  %v49_v29 = vld [vmem:[%s2989_s0 + $0xe8] sm:$0xff] }
  0x20   :  { %1402 = vmatprep.subr.mxu1 %v213_v58  ;;  %1324 = vmatprep.subr.mxu0 %v180_v59  ;;  %v275_v28 = vld [vmem:[%s2988_s1 + $0x378] sm:$0xff]  ;;  %v238_v30 = vld [vmem:[%s2988_s1 + $0x250] sm:$0xff]  ;;  %v56_v31 = vld [vmem:[%s2989_s0 + $0x120] sm:$0xff] }
  0x21   :  { %379 = vmatprep.mubr.f32.mxu0 %v21_v60  ;;  %1325 = vmatpush3.msra.mxu0 %v164_v61  ;;  %v59_v32 = vld [vmem:[%s2989_s0 + $0x138] sm:$0xff]  ;;  %v66_v33 = vld [vmem:[%s2989_s0 + $0x170] sm:$0xff]  ;;  %v253_v34 = vld [vmem:[%s2988_s1 + $0x2c8] sm:$0xff] }
  0x22   :  { %1403 = vmatpush3.msra.mxu1 %v197_v62  ;;  %380 = vmatmul.mubr.f32.vlgmr.msra.gmra.mxu0 %v20_v63  ;;  %v237_v35 = vld [vmem:[%s2988_s1 + $0x248] sm:$0xff]  ;;  %v290_v36 = vld [vmem:[%s2988_s1 + $0x3f0] sm:$0xff]  ;;  %v252_v38 = vld [vmem:[%s2988_s1 + $0x2c0] sm:$0xff] }
  0x23   :  { %1404 = vmatprep.subr.mxu1 %v212_v0  ;;  %1454 = vmatprep.subr.mxu0 %v259_v1  ;;  %v58_v37 = vld [vmem:[%s2989_s0 + $0x130] sm:$0xff]  ;;  %v65_v39 = vld [vmem:[%s2989_s0 + $0x168] sm:$0xff]  ;;  %v68_v40 = vld [vmem:[%s2989_s0 + $0x180] sm:$0xff] }
  0x24   :  { %1405 = vmatpush3.msra.mxu1 %v196_v2  ;;  %524 = vmatprep.mubr.f32.mxu1 %v23_v3  ;;  %v75_v41 = vld [vmem:[%s2989_s0 + $0x1b8] sm:$0xff]  ;;  %v236_v42 = vld [vmem:[%s2988_s1 + $0x240] sm:$0xff]  ;;  %v274_v44 = vld [vmem:[%s2988_s1 + $0x370] sm:$0xff] }
  0x25   :  { %1455 = vmatpush3.msra.mxu0 %v243_v4  ;;  %525 = vmatmul.mubr.f32.vlgmr.msra.gmra.mxu1 %v22_v5  ;;  %v251_v43 = vld [vmem:[%s2988_s1 + $0x2b8] sm:$0xff]  ;;  %v74_v47 = vld [vmem:[%s2989_s0 + $0x1b0] sm:$0xff]  ;;  %v77_v48 = vld [vmem:[%s2989_s0 + $0x1c8] sm:$0xff] }
  0x26   :  { %384 = vmatprep.mubr.f32.mxu0 %v30_v6  ;;  %1456 = vmatprep.subr.mxu0 %v258_v8  ;;  %v67_v45 = vld [vmem:[%s2989_s0 + $0x178] sm:$0xff]  ;;  %v84_v49 = vld [vmem:[%s2989_s0 + $0x200] sm:$0xff]  ;;  %v250_v50 = vld [vmem:[%s2988_s1 + $0x2b0] sm:$0xff] }
  0x27   :  { %385 = vmatmul.mubr.f32.gmra.mxu0 %v29_v7  ;;  %529 = vmatprep.mubr.f32.mxu1 %v32_v9  ;;  %v235_v46 = vld [vmem:[%s2988_s1 + $0x238] sm:$0xff]  ;;  %v234_v51 = vld [vmem:[%s2988_s1 + $0x230] sm:$0xff]  ;;  %v289_v52 = vld [vmem:[%s2988_s1 + $0x3e8] sm:$0xff] }
  0x28   :  { %1457 = vmatpush3.msra.mxu0 %v242_v10  ;;  %389 = vmatprep.mubr.f32.mxu0 %v39_v11  ;;  %v76_v53 = vld [vmem:[%s2989_s0 + $0x1c0] sm:$0xff]  ;;  %v249_v54 = vld [vmem:[%s2988_s1 + $0x2a8] sm:$0xff]  ;;  %v83_v55 = vld [vmem:[%s2989_s0 + $0x1f8] sm:$0xff] }
  0x29   :  { %1458 = vmatprep.subr.mxu0 %v257_v12  ;;  %530 = vmatmul.mubr.f32.gmra.mxu1 %v31_v13  ;;  %v86_v56 = vld [vmem:[%s2989_s0 + $0x210] sm:$0xff]  ;;  %v93_v57 = vld [vmem:[%s2989_s0 + $0x248] sm:$0xff]  ;;  %v288_v59 = vld [vmem:[%s2988_s1 + $0x3e0] sm:$0xff] }
  0x2a   :  { %1459 = vmatpush3.msra.mxu0 %v241_v14  ;;  %534 = vmatprep.mubr.f32.mxu1 %v41_v16  ;;  %v273_v58 = vld [vmem:[%s2988_s1 + $0x368] sm:$0xff]  ;;  %v248_v62 = vld [vmem:[%s2988_s1 + $0x2a0] sm:$0xff]  ;;  %v95_v0 = vld [vmem:[%s2989_s0 + $0x258] sm:$0xff] }
  0x2b   :  { %390 = vmatmul.mubr.f32.gmra.mxu0 %v38_v15  ;;  %1460 = vmatprep.subr.mxu0 %v256_v18  ;;  %v233_v60 = vld [vmem:[%s2988_s1 + $0x228] sm:$0xff]  ;;  %v92_v63 = vld [vmem:[%s2989_s0 + $0x240] sm:$0xff]  ;;  %v102_v1 = vld [vmem:[%s2989_s0 + $0x290] sm:$0xff] }
  0x2c   :  { %394 = vmatprep.mubr.f32.mxu0 %v48_v17  ;;  %1461 = vmatpush3.msra.mxu0 %v240_v19  ;;  %v85_v61 = vld [vmem:[%s2989_s0 + $0x208] sm:$0xff]  ;;  %v272_v2 = vld [vmem:[%s2988_s1 + $0x360] sm:$0xff]  ;;  %v287_v3 = vld [vmem:[%s2988_s1 + $0x3d8] sm:$0xff] }
  0x2d   :  { %1534 = vmatprep.subr.mxu1 %v291_v20  ;;  %535 = vmatmul.mubr.f32.gmra.mxu1 %v40_v21  ;;  %v232_v4 = vld [vmem:[%s2988_s1 + $0x220] sm:$0xff]  ;;  %v94_v5 = vld [vmem:[%s2989_s0 + $0x250] sm:$0xff]  ;;  %v247_v6 = vld [vmem:[%s2988_s1 + $0x298] sm:$0xff] }
  0x2e   :  { %1462 = vmatprep.subr.mxu0 %v255_v22  ;;  %539 = vmatprep.mubr.f32.mxu1 %v50_v24  ;;  %v101_v7 = vld [vmem:[%s2989_s0 + $0x288] sm:$0xff]  ;;  %v104_v8 = vld [vmem:[%s2989_s0 + $0x2a0] sm:$0xff]  ;;  %v111_v9 = vld [vmem:[%s2989_s0 + $0x2d8] sm:$0xff] }
  0x2f   :  { %395 = vmatmul.mubr.f32.gmra.mxu0 %v47_v23  ;;  %1535 = vmatpush3.msra.mxu1 %v275_v28  ;;  %v271_v10 = vld [vmem:[%s2988_s1 + $0x358] sm:$0xff]  ;;  %v286_v11 = vld [vmem:[%s2988_s1 + $0x3d0] sm:$0xff]  ;;  %v113_v16 = vld [vmem:[%s2989_s0 + $0x2e8] sm:$0xff] }
  0x30   :  { %399 = vmatprep.mubr.f32.mxu0 %v57_v25  ;;  %1463 = vmatpush3.msra.mxu0 %v239_v26  ;;  %v231_v12 = vld [vmem:[%s2988_s1 + $0x218] sm:$0xff]  ;;  %v246_v14 = vld [vmem:[%s2988_s1 + $0x290] sm:$0xff]  ;;  %v120_v17 = vld [vmem:[%s2989_s0 + $0x320] sm:$0xff] }
  0x31   :  { %1464 = vmatprep.subr.mxu0 %v254_v27  ;;  %540 = vmatmul.mubr.f32.gmra.mxu1 %v49_v29  ;;  %v103_v13 = vld [vmem:[%s2989_s0 + $0x298] sm:$0xff]  ;;  %v110_v15 = vld [vmem:[%s2989_s0 + $0x2d0] sm:$0xff]  ;;  %v285_v19 = vld [vmem:[%s2988_s1 + $0x3c8] sm:$0xff] }
  0x32   :  { %1465 = vmatpush3.msra.mxu0 %v238_v30  ;;  %544 = vmatprep.mubr.f32.mxu1 %v59_v32  ;;  %v270_v18 = vld [vmem:[%s2988_s1 + $0x350] sm:$0xff]  ;;  %v112_v21 = vld [vmem:[%s2989_s0 + $0x2e0] sm:$0xff]  ;;  %v245_v22 = vld [vmem:[%s2988_s1 + $0x288] sm:$0xff] }
  0x33   :  { %400 = vmatmul.mubr.f32.gmra.mxu0 %v56_v31  ;;  %1466 = vmatprep.subr.mxu0 %v253_v34  ;;  %v230_v20 = vld [vmem:[%s2988_s1 + $0x210] sm:$0xff]  ;;  %v119_v23 = vld [vmem:[%s2989_s0 + $0x318] sm:$0xff]  ;;  %v129_v25 = vld [vmem:[%s2989_s0 + $0x368] sm:$0xff] }
  0x34   :  { %404 = vmatprep.mubr.f32.mxu0 %v66_v33  ;;  %1467 = vmatpush3.msra.mxu0 %v237_v35  ;;  %v122_v24 = vld [vmem:[%s2989_s0 + $0x330] sm:$0xff]  ;;  %v269_v26 = vld [vmem:[%s2988_s1 + $0x348] sm:$0xff]  ;;  %v284_v27 = vld [vmem:[%s2988_s1 + $0x3c0] sm:$0xff] }
  0x35   :  { %1536 = vmatprep.subr.mxu1 %v290_v36  ;;  %545 = vmatmul.mubr.f32.gmra.mxu1 %v58_v37  ;;  %v229_v28 = vld [vmem:[%s2988_s1 + $0x208] sm:$0xff]  ;;  %v244_v30 = vld [vmem:[%s2988_s1 + $0x280] sm:$0xff]  ;;  %v131_v32 = vld [vmem:[%s2989_s0 + $0x378] sm:$0xff] }
  0x36   :  { %1468 = vmatprep.subr.mxu0 %v252_v38  ;;  %549 = vmatprep.mubr.f32.mxu1 %v68_v40  ;;  %v121_v29 = vld [vmem:[%s2989_s0 + $0x328] sm:$0xff]  ;;  %v128_v31 = vld [vmem:[%s2989_s0 + $0x360] sm:$0xff]  ;;  %v138_v34 = vld [vmem:[%s2989_s0 + $0x3b0] sm:$0xff] }
  0x37   :  { %405 = vmatmul.mubr.f32.gmra.mxu0 %v65_v39  ;;  %1537 = vmatpush3.msra.mxu1 %v274_v44  ;;  %v268_v33 = vld [vmem:[%s2988_s1 + $0x340] sm:$0xff]  ;;  %v283_v35 = vld [vmem:[%s2988_s1 + $0x3b8] sm:$0xff]  ;;  %v130_v37 = vld [vmem:[%s2989_s0 + $0x370] sm:$0xff] }
  0x38   :  { %409 = vmatprep.mubr.f32.mxu0 %v75_v41  ;;  %1469 = vmatpush3.msra.mxu0 %v236_v42  ;;  %v228_v36 = vld [vmem:[%s2988_s1 + $0x200] sm:$0xff]  ;;  %v2321_v38 = vld [vmem:[%s2988_s1 + $0x478] sm:$0xff]  ;;  %v137_v40 = vld [vmem:[%s2989_s0 + $0x3a8] sm:$0xff] }
  0x39   :  { %1470 = vmatprep.subr.mxu0 %v251_v43  ;;  %550 = vmatmul.mubr.f32.gmra.mxu1 %v67_v45  ;;  %v267_v39 = vld [vmem:[%s2988_s1 + $0x338] sm:$0xff]  ;;  %v282_v41 = vld [vmem:[%s2988_s1 + $0x3b0] sm:$0xff]  ;;  %v140_v42 = vld [vmem:[%s2989_s0 + $0x3c0] sm:$0xff] }
  0x3a   :  { %1471 = vmatpush3.msra.mxu0 %v235_v46  ;;  %554 = vmatprep.mubr.f32.mxu1 %v77_v48  ;;  %v266_v43 = vld [vmem:[%s2988_s1 + $0x330] sm:$0xff]  ;;  %v147_v44 = vld [vmem:[%s2989_s0 + $0x3f8] sm:$0xff]  ;;  %v281_v46 = vld [vmem:[%s2988_s1 + $0x3a8] sm:$0xff] }
  0x3b   :  { %410 = vmatmul.mubr.f32.gmra.mxu0 %v74_v47  ;;  %1472 = vmatprep.subr.mxu0 %v250_v50  ;;  %v139_v45 = vld [vmem:[%s2989_s0 + $0x3b8] sm:$0xff]  ;;  %v265_v47 = vld [vmem:[%s2988_s1 + $0x328] sm:$0xff]  ;;  %v146_v48 = vld [vmem:[%s2989_s0 + $0x3f0] sm:$0xff] }
  0x3c   :  { %414 = vmatprep.mubr.f32.mxu0 %v84_v49  ;;  %1473 = vmatpush3.msra.mxu0 %v234_v51  ;;  %v280_v49 = vld [vmem:[%s2988_s1 + $0x3a0] sm:$0xff]  ;;  %v149_v50 = vld [vmem:[%s2989_s0 + $0x408] sm:$0xff] }
  0x3d   :  { %1538 = vmatprep.subr.mxu1 %v289_v52  ;;  %555 = vmatmul.mubr.f32.gmra.mxu1 %v76_v53  ;;  %v264_v51 = vld [vmem:[%s2988_s1 + $0x320] sm:$0xff] }
  0x3e   :  { %1474 = vmatprep.subr.mxu0 %v249_v54  ;;  %559 = vmatprep.mubr.f32.mxu1 %v86_v56  ;;  %v156_v52 = vld [vmem:[%s2989_s0 + $0x440] sm:$0xff]  ;;  %v279_v54 = vld [vmem:[%s2988_s1 + $0x398] sm:$0xff] }
  0x3f   :  { %415 = vmatmul.mubr.f32.gmra.mxu0 %v83_v55  ;;  %1539 = vmatpush3.msra.mxu1 %v273_v58  ;;  %v148_v53 = vld [vmem:[%s2989_s0 + $0x400] sm:$0xff]  ;;  %v263_v55 = vld [vmem:[%s2988_s1 + $0x318] sm:$0xff]  ;;  %v158_v58 = vld [vmem:[%s2989_s0 + $0x450] sm:$0xff] }
  0x40   :  { %419 = vmatprep.mubr.f32.mxu0 %v93_v57  ;;  %1540 = vmatprep.subr.mxu1 %v288_v59  ;;  %v155_v56 = vld [vmem:[%s2989_s0 + $0x438] sm:$0xff]  ;;  %v278_v57 = vld [vmem:[%s2988_s1 + $0x390] sm:$0xff] }
  0x41   :  { %1475 = vmatpush3.msra.mxu0 %v233_v60  ;;  %560 = vmatmul.mubr.f32.gmra.mxu1 %v85_v61  ;;  %v262_v59 = vld [vmem:[%s2988_s1 + $0x310] sm:$0xff]  ;;  %v25_v60 = vld [vmem:[%s2989_s0 + $0x28] sm:$0xff] }
  0x42   :  { %1476 = vmatprep.subr.mxu0 %v248_v62  ;;  %564 = vmatprep.mubr.f32.mxu1 %v95_v0  ;;  %v157_v61 = vld [vmem:[%s2989_s0 + $0x448] sm:$0xff]  ;;  %v24_v0 = vld [vmem:[%s2989_s0 + $0x20] sm:$0xff] }
  0x43   :  { %420 = vmatmul.mubr.f32.gmra.mxu0 %v92_v63  ;;  %1541 = vmatpush3.msra.mxu1 %v272_v2  ;;  %v277_v62 = vld [vmem:[%s2988_s1 + $0x388] sm:$0xff]  ;;  %v27_v2 = vld [vmem:[%s2989_s0 + $0x38] sm:$0xff] }
  0x44   :  { %424 = vmatprep.mubr.f32.mxu0 %v102_v1  ;;  %1542 = vmatprep.subr.mxu1 %v287_v3  ;;  %v261_v63 = vld [vmem:[%s2988_s1 + $0x308] sm:$0xff]  ;;  %v276_v1 = vld [vmem:[%s2988_s1 + $0x380] sm:$0xff] }
  0x45   :  { %1477 = vmatpush3.msra.mxu0 %v232_v4  ;;  %565 = vmatmul.mubr.f32.gmra.mxu1 %v94_v5  ;;  %v260_v3 = vld [vmem:[%s2988_s1 + $0x300] sm:$0xff]  ;;  %v26_v4 = vld [vmem:[%s2989_s0 + $0x30] sm:$0xff] }
  0x46   :  { %1478 = vmatprep.subr.mxu0 %v247_v6  ;;  %569 = vmatprep.mubr.f32.mxu1 %v104_v8  ;;  %v34_v5 = vld [vmem:[%s2989_s0 + $0x70] sm:$0xff]  ;;  %v33_v6 = vld [vmem:[%s2989_s0 + $0x68] sm:$0xff]  ;;  %v36_v8 = vld [vmem:[%s2989_s0 + $0x80] sm:$0xff] }
  0x47   :  { %425 = vmatmul.mubr.f32.gmra.mxu0 %v101_v7  ;;  %1543 = vmatpush3.msra.mxu1 %v271_v10  ;;  %v306_v7 = vld [vmem:[%s2988_s1 + $0x470] sm:$0xff]  ;;  %v305_v10 = vld [vmem:[%s2988_s1 + $0x468] sm:$0xff] }
  0x48   :  { %429 = vmatprep.mubr.f32.mxu0 %v111_v9  ;;  %1544 = vmatprep.subr.mxu1 %v286_v11  ;;  %v43_v9 = vld [vmem:[%s2989_s0 + $0xb8] sm:$0xff] }
  0x49   :  { %1479 = vmatpush3.msra.mxu0 %v231_v12  ;;  %570 = vmatmul.mubr.f32.gmra.mxu1 %v103_v13  ;;  %v35_v11 = vld [vmem:[%s2989_s0 + $0x78] sm:$0xff]  ;;  %v42_v12 = vld [vmem:[%s2989_s0 + $0xb0] sm:$0xff]  ;;  %v45_v13 = vld [vmem:[%s2989_s0 + $0xc8] sm:$0xff] }
  0x4a   :  { %1480 = vmatprep.subr.mxu0 %v246_v14  ;;  %574 = vmatprep.mubr.f32.mxu1 %v113_v16  ;;  %v52_v14 = vld [vmem:[%s2989_s0 + $0x100] sm:$0xff] }
  0x4b   :  { %430 = vmatmul.mubr.f32.gmra.mxu0 %v110_v15  ;;  %1545 = vmatpush3.msra.mxu1 %v270_v18  ;;  %v304_v15 = vld [vmem:[%s2988_s1 + $0x460] sm:$0xff]  ;;  %v51_v18 = vld [vmem:[%s2989_s0 + $0xf8] sm:$0xff] }
  0x4c   :  { %434 = vmatprep.mubr.f32.mxu0 %v120_v17  ;;  %1546 = vmatprep.subr.mxu1 %v285_v19  ;;  %v44_v16 = vld [vmem:[%s2989_s0 + $0xc0] sm:$0xff]  ;;  %v303_v17 = vld [vmem:[%s2988_s1 + $0x458] sm:$0xff]  ;;  %v54_v19 = vld [vmem:[%s2989_s0 + $0x110] sm:$0xff] }
  0x4d   :  { %1481 = vmatpush3.msra.mxu0 %v230_v20  ;;  %575 = vmatmul.mubr.f32.gmra.mxu1 %v112_v21  ;;  %v61_v20 = vld [vmem:[%s2989_s0 + $0x148] sm:$0xff]  ;;  %v302_v21 = vld [vmem:[%s2988_s1 + $0x450] sm:$0xff] }
  0x4e   :  { %1482 = vmatprep.subr.mxu0 %v245_v22  ;;  %579 = vmatprep.mubr.f32.mxu1 %v122_v24  ;;  %v53_v22 = vld [vmem:[%s2989_s0 + $0x108] sm:$0xff]  ;;  %v63_v24 = vld [vmem:[%s2989_s0 + $0x158] sm:$0xff] }
  0x4f   :  { %435 = vmatmul.mubr.f32.gmra.mxu0 %v119_v23  ;;  %1547 = vmatpush3.msra.mxu1 %v269_v26  ;;  %v60_v23 = vld [vmem:[%s2989_s0 + $0x140] sm:$0xff]  ;;  %v301_v26 = vld [vmem:[%s2988_s1 + $0x448] sm:$0xff] }
  0x50   :  { %439 = vmatprep.mubr.f32.mxu0 %v129_v25  ;;  %1548 = vmatprep.subr.mxu1 %v284_v27  ;;  %v70_v25 = vld [vmem:[%s2989_s0 + $0x190] sm:$0xff] }
  0x51   :  { %1483 = vmatpush3.msra.mxu0 %v229_v28  ;;  %580 = vmatmul.mubr.f32.gmra.mxu1 %v121_v29  ;;  %v62_v27 = vld [vmem:[%s2989_s0 + $0x150] sm:$0xff]  ;;  %v300_v28 = vld [vmem:[%s2988_s1 + $0x440] sm:$0xff]  ;;  %v69_v29 = vld [vmem:[%s2989_s0 + $0x188] sm:$0xff] }
  0x52   :  { %1484 = vmatprep.subr.mxu0 %v244_v30  ;;  %584 = vmatprep.mubr.f32.mxu1 %v131_v32  ;;  %v72_v30 = vld [vmem:[%s2989_s0 + $0x1a0] sm:$0xff]  ;;  %v299_v32 = vld [vmem:[%s2988_s1 + $0x438] sm:$0xff] }
  0x53   :  { %440 = vmatmul.mubr.f32.gmra.mxu0 %v128_v31  ;;  %1549 = vmatpush3.msra.mxu1 %v268_v33  ;;  %v79_v31 = vld [vmem:[%s2989_s0 + $0x1d8] sm:$0xff] }
  0x54   :  { %444 = vmatprep.mubr.f32.mxu0 %v138_v34  ;;  %1550 = vmatprep.subr.mxu1 %v283_v35  ;;  %v71_v33 = vld [vmem:[%s2989_s0 + $0x198] sm:$0xff]  ;;  %v78_v34 = vld [vmem:[%s2989_s0 + $0x1d0] sm:$0xff]  ;;  %v81_v35 = vld [vmem:[%s2989_s0 + $0x1e8] sm:$0xff] }
  0x55   :  { %1485 = vmatpush3.msra.mxu0 %v228_v36  ;;  %585 = vmatmul.mubr.f32.gmra.mxu1 %v130_v37  ;;  %v88_v36 = vld [vmem:[%s2989_s0 + $0x220] sm:$0xff]  ;;  %v298_v37 = vld [vmem:[%s2988_s1 + $0x430] sm:$0xff] }
  0x56   :  { %1678 = vmatprep.subr.mxu0 %v2321_v38  ;;  %1551 = vmatpush3.msra.mxu1 %v267_v39  ;;  %v297_v39 = vld [vmem:[%s2988_s1 + $0x428] sm:$0xff] }
  0x57   :  { %445 = vmatmul.mubr.f32.gmra.mxu0 %v137_v40  ;;  %1552 = vmatprep.subr.mxu1 %v282_v41  ;;  %v87_v40 = vld [vmem:[%s2989_s0 + $0x218] sm:$0xff]  ;;  %v90_v41 = vld [vmem:[%s2989_s0 + $0x230] sm:$0xff] }
  0x58   :  { %589 = vmatprep.mubr.f32.mxu1 %v140_v42  ;;  %1553 = vmatpush3.msra.mxu1 %v266_v43  ;;  %v97_v42 = vld [vmem:[%s2989_s0 + $0x268] sm:$0xff]  ;;  %v296_v43 = vld [vmem:[%s2988_s1 + $0x420] sm:$0xff] }
  0x59   :  { %449 = vmatprep.mubr.f32.mxu0 %v147_v44  ;;  %590 = vmatmul.mubr.f32.gmra.mxu1 %v139_v45  ;;  %v89_v44 = vld [vmem:[%s2989_s0 + $0x228] sm:$0xff]  ;;  %v96_v45 = vld [vmem:[%s2989_s0 + $0x260] sm:$0xff] }
  0x5a   :  { %1554 = vmatprep.subr.mxu1 %v281_v46  ;;  %594 = vmatprep.mubr.f32.mxu1 %v149_v50  ;;  %v99_v46 = vld [vmem:[%s2989_s0 + $0x278] sm:$0xff]  ;;  %v294_v50 = vld [vmem:[%s2988_s1 + $0x410] sm:$0xff] }
  0x5b   :  { %1555 = vmatpush3.msra.mxu1 %v265_v47  ;;  %450 = vmatmul.mubr.f32.gmra.mxu0 %v146_v48  ;;  %v106_v47 = vld [vmem:[%s2989_s0 + $0x2b0] sm:$0xff]  ;;  %v295_v48 = vld [vmem:[%s2988_s1 + $0x418] sm:$0xff] }
  0x5c   :  { %1556 = vmatprep.subr.mxu1 %v280_v49  ;;  %454 = vmatprep.mubr.f32.mxu0 %v156_v52  ;;  %v98_v49 = vld [vmem:[%s2989_s0 + $0x270] sm:$0xff]  ;;  %v108_v52 = vld [vmem:[%s2989_s0 + $0x2c0] sm:$0xff] }
  0x5d   :  { %1557 = vmatpush3.msra.mxu1 %v264_v51  ;;  %v105_v51 = vld [vmem:[%s2989_s0 + $0x2a8] sm:$0xff] }
  0x5e   :  { %595 = vmatmul.mubr.f32.gmra.mxu1 %v148_v53  ;;  %1558 = vmatprep.subr.mxu1 %v279_v54  ;;  %v115_v53 = vld [vmem:[%s2989_s0 + $0x2f8] sm:$0xff]  ;;  %v293_v54 = vld [vmem:[%s2988_s1 + $0x408] sm:$0xff] }
  0x5f   :  { %1559 = vmatpush3.msra.mxu1 %v263_v55  ;;  %455 = vmatmul.mubr.f32.gmra.mxu0 %v155_v56  ;;  %v107_v55 = vld [vmem:[%s2989_s0 + $0x2b8] sm:$0xff]  ;;  %v114_v56 = vld [vmem:[%s2989_s0 + $0x2f0] sm:$0xff] }
  0x60   :  { %1560 = vmatprep.subr.mxu1 %v278_v57  ;;  %599 = vmatprep.mubr.f32.mxu1 %v158_v58  ;;  %v117_v57 = vld [vmem:[%s2989_s0 + $0x308] sm:$0xff]  ;;  %v124_v58 = vld [vmem:[%s2989_s0 + $0x340] sm:$0xff] }
  0x61   :  { %1561 = vmatpush3.msra.mxu1 %v262_v59  ;;  %669 = vmatprep.mubr.f32.mxu0 %v25_v60  ;;  %v292_v59 = vld [vmem:[%s2988_s1 + $0x400] sm:$0xff] }
  0x62   :  { %600 = vmatmul.mubr.f32.gmra.mxu1 %v157_v61  ;;  %1562 = vmatprep.subr.mxu1 %v277_v62  ;;  %v116_v60 = vld [vmem:[%s2989_s0 + $0x300] sm:$0xff]  ;;  %v123_v61 = vld [vmem:[%s2989_s0 + $0x338] sm:$0xff]  ;;  %v126_v62 = vld [vmem:[%s2989_s0 + $0x350] sm:$0xff] }
  0x63   :  { %1563 = vmatpush3.msra.mxu1 %v261_v63  ;;  %670 = vmatmul.mubr.f32.vlgmr.msra.gmra.mxu0 %v24_v0  ;;  %v133_v63 = vld [vmem:[%s2989_s0 + $0x388] sm:$0xff] }
  0x64   :  { %1564 = vmatprep.subr.mxu1 %v276_v1  ;;  %814 = vmatprep.mubr.f32.mxu1 %v27_v2  ;;  %v125_v0 = vld [vmem:[%s2989_s0 + $0x348] sm:$0xff]  ;;  %v132_v1 = vld [vmem:[%s2989_s0 + $0x380] sm:$0xff]  ;;  %v135_v2 = vld [vmem:[%s2989_s0 + $0x398] sm:$0xff] }
  0x65   :  { %1565 = vmatpush3.msra.mxu1 %v260_v3  ;;  %1679 = vmatpush3.msra.mxu0 %v2321_v38  ;;  %v80_v38 = vld [vmem:[%s2989_s0 + $0x1e0] sm:$0xff]  ;;  %v142_v3 = vld [vmem:[%s2989_s0 + $0x3d0] sm:$0xff] }
  0x66   :  { %815 = vmatmul.mubr.f32.vlgmr.msra.gmra.mxu1 %v26_v4  ;;  %674 = vmatprep.mubr.f32.mxu0 %v34_v5  ;;  %v134_v4 = vld [vmem:[%s2989_s0 + $0x390] sm:$0xff]  ;;  %v141_v5 = vld [vmem:[%s2989_s0 + $0x3c8] sm:$0xff] }
  0x67   :  { %675 = vmatmul.mubr.f32.gmra.mxu0 %v33_v6  ;;  %1680 = vmatprep.subr.mxu0 %v306_v7  ;;  %v144_v6 = vld [vmem:[%s2989_s0 + $0x3e0] sm:$0xff] }
  0x68   :  { %819 = vmatprep.mubr.f32.mxu1 %v36_v8  ;;  %1681 = vmatpush3.msra.mxu0 %v306_v7  ;;  %v151_v7 = vld [vmem:[%s2989_s0 + $0x418] sm:$0xff] }
  0x69   :  { %679 = vmatprep.mubr.f32.mxu0 %v43_v9  ;;  %1682 = vmatprep.subr.mxu0 %v305_v10  ;;  %v143_v8 = vld [vmem:[%s2989_s0 + $0x3d8] sm:$0xff]  ;;  %v150_v9 = vld [vmem:[%s2989_s0 + $0x410] sm:$0xff] }
  0x6a   :  { %820 = vmatmul.mubr.f32.gmra.mxu1 %v35_v11  ;;  %1683 = vmatpush3.msra.mxu0 %v305_v10  ;;  %v153_v10 = vld [vmem:[%s2989_s0 + $0x428] sm:$0xff]  ;;  %v160_v11 = vld [vmem:[%s2989_s0 + $0x460] sm:$0xff] }
  0x6b   :  { %680 = vmatmul.mubr.f32.gmra.mxu0 %v42_v12  ;;  %824 = vmatprep.mubr.f32.mxu1 %v45_v13  ;;  %v152_v12 = vld [vmem:[%s2989_s0 + $0x420] sm:$0xff]  ;;  %v159_v13 = vld [vmem:[%s2989_s0 + $0x458] sm:$0xff] }
  0x6c   :  { %684 = vmatprep.mubr.f32.mxu0 %v52_v14  ;;  %1684 = vmatprep.subr.mxu0 %v304_v15  ;;  %v162_v14 = vld [vmem:[%s2989_s0 + $0x470] sm:$0xff] }
  0x6d   :  { %1685 = vmatpush3.msra.mxu0 %v304_v15  ;;  %v28_v15 = vld [vmem:[%s2989_s0 + $0x40] sm:$0xff] }
  0x6e   :  { %825 = vmatmul.mubr.f32.gmra.mxu1 %v44_v16  ;;  %1686 = vmatprep.subr.mxu0 %v303_v17  ;;  %v161_v16 = vld [vmem:[%s2989_s0 + $0x468] sm:$0xff] }
  0x6f   :  { %685 = vmatmul.mubr.f32.gmra.mxu0 %v51_v18  ;;  %829 = vmatprep.mubr.f32.mxu1 %v54_v19  ;;  %v46_v18 = vld [vmem:[%s2989_s0 + $0xd0] sm:$0xff]  ;;  %v55_v19 = vld [vmem:[%s2989_s0 + $0x118] sm:$0xff] }
  0x70   :  { %689 = vmatprep.mubr.f32.mxu0 %v61_v20  ;;  %1687 = vmatpush3.msra.mxu0 %v303_v17  ;;  %v37_v17 = vld [vmem:[%s2989_s0 + $0x88] sm:$0xff]  ;;  %v64_v20 = vld [vmem:[%s2989_s0 + $0x160] sm:$0xff] }
  0x71   :  { %1688 = vmatprep.subr.mxu0 %v302_v21 }
  0x72   :  { %830 = vmatmul.mubr.f32.gmra.mxu1 %v53_v22  ;;  %1689 = vmatpush3.msra.mxu0 %v302_v21  ;;  %v73_v21 = vld [vmem:[%s2989_s0 + $0x1a8] sm:$0xff]  ;;  %v82_v22 = vld [vmem:[%s2989_s0 + $0x1f0] sm:$0xff] }
  0x73   :  { %690 = vmatmul.mubr.f32.gmra.mxu0 %v60_v23  ;;  %834 = vmatprep.mubr.f32.mxu1 %v63_v24  ;;  %v91_v23 = vld [vmem:[%s2989_s0 + $0x238] sm:$0xff]  ;;  %v100_v24 = vld [vmem:[%s2989_s0 + $0x280] sm:$0xff] }
  0x74   :  { %694 = vmatprep.mubr.f32.mxu0 %v70_v25  ;;  %1690 = vmatprep.subr.mxu0 %v301_v26  ;;  %v109_v25 = vld [vmem:[%s2989_s0 + $0x2c8] sm:$0xff] }
  0x75   :  { %1691 = vmatpush3.msra.mxu0 %v301_v26  ;;  %v118_v26 = vld [vmem:[%s2989_s0 + $0x310] sm:$0xff] }
  0x76   :  { %835 = vmatmul.mubr.f32.gmra.mxu1 %v62_v27  ;;  %1692 = vmatprep.subr.mxu0 %v300_v28  ;;  %v1087_v27 = vld [vmem:[%s2990_s3 + $0x78] sm:$0xff] }
  0x77   :  { %695 = vmatmul.mubr.f32.gmra.mxu0 %v69_v29  ;;  %839 = vmatprep.mubr.f32.mxu1 %v72_v30  ;;  %v1086_v29 = vld [vmem:[%s2990_s3 + $0x70] sm:$0xff]  ;;  %v136_v30 = vld [vmem:[%s2989_s0 + $0x3a0] sm:$0xff] }
  0x78   :  { %699 = vmatprep.mubr.f32.mxu0 %v79_v31  ;;  %1693 = vmatpush3.msra.mxu0 %v300_v28  ;;  %v127_v28 = vld [vmem:[%s2989_s0 + $0x358] sm:$0xff]  ;;  %v145_v31 = vld [vmem:[%s2989_s0 + $0x3e8] sm:$0xff] }
  0x79   :  { %1694 = vmatprep.subr.mxu0 %v299_v32  ;;  %1734 = vmatprep.subr.mxu1 %v1087_v27 }
  0x7a   :  { %840 = vmatmul.mubr.f32.gmra.mxu1 %v71_v33  ;;  %1695 = vmatpush3.msra.mxu0 %v299_v32  ;;  %v1085_v32 = vld [vmem:[%s2990_s3 + $0x68] sm:$0xff]  ;;  %v154_v33 = vld [vmem:[%s2989_s0 + $0x430] sm:$0xff] }
  0x7b   :  { %700 = vmatmul.mubr.f32.gmra.mxu0 %v78_v34  ;;  %844 = vmatprep.mubr.f32.mxu1 %v81_v35  ;;  %v163_v34 = vld [vmem:[%s2989_s0 + $0x478] sm:$0xff]  ;;  %v1084_v35 = vld [vmem:[%s2990_s3 + $0x60] sm:$0xff] }
  0x7c   :  { %704 = vmatprep.mubr.f32.mxu0 %v88_v36  ;;  %1696 = vmatprep.subr.mxu0 %v298_v37  ;;  %v1083_v36 = vld [vmem:[%s2990_s3 + $0x58] sm:$0xff] }
  0x7d   :  { %1697 = vmatpush3.msra.mxu0 %v298_v37  ;;  %1735 = vmatpush3.msra.mxu1 %v1087_v27  ;;  %v1082_v37 = vld [vmem:[%s2990_s3 + $0x50] sm:$0xff] }
  0x7e   :  { %845 = vmatmul.mubr.f32.gmra.mxu1 %v80_v38  ;;  %1698 = vmatprep.subr.mxu0 %v297_v39  ;;  %v1081_v38 = vld [vmem:[%s2990_s3 + $0x48] sm:$0xff] }
  0x7f   :  { %705 = vmatmul.mubr.f32.gmra.mxu0 %v87_v40  ;;  %849 = vmatprep.mubr.f32.mxu1 %v90_v41  ;;  %v1079_v40 = vld [vmem:[%s2990_s3 + $0x38] sm:$0xff]  ;;  %v1078_v41 = vld [vmem:[%s2990_s3 + $0x30] sm:$0xff] }
  0x80   :  { %709 = vmatprep.mubr.f32.mxu0 %v97_v42  ;;  %1699 = vmatpush3.msra.mxu0 %v297_v39  ;;  %v1080_v39 = vld [vmem:[%s2990_s3 + $0x40] sm:$0xff]  ;;  %v1077_v42 = vld [vmem:[%s2990_s3 + $0x28] sm:$0xff] }
  0x81   :  { %1700 = vmatprep.subr.mxu0 %v296_v43  ;;  %1736 = vmatprep.subr.mxu1 %v1086_v29 }
  0x82   :  { %850 = vmatmul.mubr.f32.gmra.mxu1 %v89_v44  ;;  %1701 = vmatpush3.msra.mxu0 %v296_v43  ;;  %v1076_v43 = vld [vmem:[%s2990_s3 + $0x20] sm:$0xff]  ;;  %v1075_v44 = vld [vmem:[%s2990_s3 + $0x18] sm:$0xff] }
  0x83   :  { %710 = vmatmul.mubr.f32.gmra.mxu0 %v96_v45  ;;  %854 = vmatprep.mubr.f32.mxu1 %v99_v46  ;;  %v1074_v46 = vld [vmem:[%s2990_s3 + $0x10] sm:$0xff] }
  0x84   :  { %714 = vmatprep.mubr.f32.mxu0 %v106_v47  ;;  %1702 = vmatprep.subr.mxu0 %v295_v48  ;;  %v2733_v47 = vld [vmem:[%s2991_s2] ss:$0 sm:$0xff] }
  0x85   :  { %1703 = vmatpush3.msra.mxu0 %v295_v48  ;;  %1737 = vmatpush3.msra.mxu1 %v1086_v29  ;;  %2995 = vst [vmem:[#allocation2_spill] sm:$0xff] %v2733_v47 }
  0x86   :  { %855 = vmatmul.mubr.f32.gmra.mxu1 %v98_v49  ;;  %1704 = vmatprep.subr.mxu0 %v294_v50 }
  0x87   :  { %715 = vmatmul.mubr.f32.gmra.mxu0 %v105_v51  ;;  %859 = vmatprep.mubr.f32.mxu1 %v108_v52 }
  0x88   :  { %719 = vmatprep.mubr.f32.mxu0 %v115_v53  ;;  %1705 = vmatpush3.msra.mxu0 %v294_v50 }
  0x89   :  { %1706 = vmatprep.subr.mxu0 %v293_v54  ;;  %1738 = vmatprep.subr.mxu1 %v1085_v32 }
  0x8a   :  { %860 = vmatmul.mubr.f32.gmra.mxu1 %v107_v55  ;;  %1707 = vmatpush3.msra.mxu0 %v293_v54 }
  0x8b   :  { %720 = vmatmul.mubr.f32.gmra.mxu0 %v114_v56  ;;  %864 = vmatprep.mubr.f32.mxu1 %v117_v57  ;;  %v1073_v56 = vld [vmem:[%s2990_s3 + $0x8] sm:$0xff] }
  0x8c   :  { %724 = vmatprep.mubr.f32.mxu0 %v124_v58  ;;  %1708 = vmatprep.subr.mxu0 %v292_v59 }
  0x8d   :  { %1709 = vmatpush3.msra.mxu0 %v292_v59  ;;  %1739 = vmatpush3.msra.mxu1 %v1085_v32 }
  0x8e   :  { %865 = vmatmul.mubr.f32.gmra.mxu1 %v116_v60  ;;  %1740 = vmatprep.subr.mxu1 %v1084_v35 }
  0x8f   :  { %725 = vmatmul.mubr.f32.gmra.mxu0 %v123_v61  ;;  %869 = vmatprep.mubr.f32.mxu1 %v126_v62  ;;  %v1072_v61 = vld [vmem:[%s2990_s3] sm:$0xff] }
  0x90   :  { %729 = vmatprep.mubr.f32.mxu0 %v133_v63  ;;  %1741 = vmatpush3.msra.mxu1 %v1084_v35 }
  0x91   :  { %1742 = vmatprep.subr.mxu1 %v1083_v36 }
  0x92   :  { %870 = vmatmul.mubr.f32.gmra.mxu1 %v125_v0 }
  0x93   :  { %730 = vmatmul.mubr.f32.gmra.mxu0 %v132_v1  ;;  %874 = vmatprep.mubr.f32.mxu1 %v135_v2 }
  0x94   :  { %734 = vmatprep.mubr.f32.mxu0 %v142_v3  ;;  %1743 = vmatpush3.msra.mxu1 %v1083_v36 }
  0x95   :  { %1744 = vmatprep.subr.mxu1 %v1082_v37 }
  0x96   :  { %875 = vmatmul.mubr.f32.gmra.mxu1 %v134_v4 }
  0x97   :  { %735 = vmatmul.mubr.f32.gmra.mxu0 %v141_v5  ;;  %879 = vmatprep.mubr.f32.mxu1 %v144_v6 }
  0x98   :  { %739 = vmatprep.mubr.f32.mxu0 %v151_v7  ;;  %1745 = vmatpush3.msra.mxu1 %v1082_v37 }
  0x99   :  { %1746 = vmatprep.subr.mxu1 %v1081_v38 }
  0x9a   :  { %880 = vmatmul.mubr.f32.gmra.mxu1 %v143_v8 }
  0x9b   :  { %740 = vmatmul.mubr.f32.gmra.mxu0 %v150_v9  ;;  %884 = vmatprep.mubr.f32.mxu1 %v153_v10 }
  0x9c   :  { %744 = vmatprep.mubr.f32.mxu0 %v160_v11  ;;  %1747 = vmatpush3.msra.mxu1 %v1081_v38 }
  0x9d   :  { %1748 = vmatprep.subr.mxu1 %v1080_v39 }
  0x9e   :  { %885 = vmatmul.mubr.f32.gmra.mxu1 %v152_v12 }
  0x9f   :  { %745 = vmatmul.mubr.f32.gmra.mxu0 %v159_v13  ;;  %889 = vmatprep.mubr.f32.mxu1 %v162_v14 }
  0xa0   :  { %1710 = vmatprep.mubr.f32.mxu0 %v28_v15  ;;  %1749 = vmatpush3.msra.mxu1 %v1080_v39 }
  0xa1   :  { %1750 = vmatprep.subr.mxu1 %v1079_v40 }
  0xa2   :  { %890 = vmatmul.mubr.f32.gmra.mxu1 %v161_v16 }
  0xa3   :  { %1711 = vmatmul.mubr.f32.vlgmr.msra.gmra.mxu0 %v37_v17  ;;  %1751 = vmatpush3.msra.mxu1 %v1079_v40 }
  0xa4   :  { %1713 = vmatprep.mubr.f32.mxu0 %v46_v18  ;;  %1752 = vmatprep.subr.mxu1 %v1078_v41 }
  0xa5   :  { %1753 = vmatpush3.msra.mxu1 %v1078_v41 }
  0xa6   :  { %1754 = vmatprep.subr.mxu1 %v1077_v42 }
  0xa7   :  { %1714 = vmatmul.mubr.f32.gmra.mxu0 %v55_v19  ;;  %1755 = vmatpush3.msra.mxu1 %v1077_v42 }
  0xa8   :  { %1716 = vmatprep.mubr.f32.mxu0 %v64_v20  ;;  %1756 = vmatprep.subr.mxu1 %v1076_v43 }
  0xa9   :  { %1757 = vmatpush3.msra.mxu1 %v1076_v43 }
  0xaa   :  { %1758 = vmatprep.subr.mxu1 %v1075_v44 }
  0xab   :  { %1717 = vmatmul.mubr.f32.gmra.mxu0 %v73_v21  ;;  %1759 = vmatpush3.msra.mxu1 %v1075_v44 }
  0xac   :  { %1719 = vmatprep.mubr.f32.mxu0 %v82_v22  ;;  %1760 = vmatprep.subr.mxu1 %v1074_v46 }
  0xad   :  { %1761 = vmatpush3.msra.mxu1 %v1074_v46 }
  0xae   :  { %1762 = vmatprep.subr.mxu1 %v1073_v56 }
  0xaf   :  { %1720 = vmatmul.mubr.f32.gmra.mxu0 %v91_v23  ;;  %1763 = vmatpush3.msra.mxu1 %v1073_v56 }
  0xb0   :  { %1722 = vmatprep.mubr.f32.mxu0 %v100_v24  ;;  %1764 = vmatprep.subr.mxu1 %v1072_v61 }
  0xb1   :  { %1765 = vmatpush3.msra.mxu1 %v1072_v61 }
  0xb3   :  { %1723 = vmatmul.mubr.f32.gmra.mxu0 %v109_v25 }
  0xb4   :  { %1725 = vmatprep.mubr.f32.mxu0 %v118_v26 }
  0xb7   :  { %1726 = vmatmul.mubr.f32.gmra.mxu0 %v127_v28 }
  0xb8   :  { %1728 = vmatprep.mubr.f32.mxu0 %v136_v30 }
  0xbb   :  { %1729 = vmatmul.mubr.f32.gmra.mxu0 %v145_v31 }
  0xbc   :  { %1731 = vmatprep.mubr.f32.mxu0 %v154_v33 }
  0xbf   :  { %1732 = vmatmul.mubr.f32.gmra.mxu0 %v163_v34 }
  0xe2   :  { %v1326_v45 = vpop.f32.mrf.mxu0 }
  0xe4   :  { %v1327_v48 = vpop.f32.mrf.mxu0 }
  0xe5   :  { %v1328_v49 = vadd.f32 %v1327_v48, %v1326_v45  ;;  %v1406_v50 = vpop.f32.mrf.mxu1 }
  0xe7   :  { %v1329_v51 = vpop.f32.mrf.mxu0  ;;  %v382_v52 = vadd.f32 %v1328_v49, %v2733_v47  ;;  %v1407_v53 = vpop.f32.mrf.mxu1 }
  0xe8   :  { %v1408_v54 = vadd.f32 %v1407_v53, %v1406_v50 }
  0xe9   :  { %v1330_v55 = vpop.f32.mrf.mxu0  ;;  %v1409_v58 = vpop.f32.mrf.mxu1 }
  0xea   :  { %v1331_v57 = vadd.f32 %v1330_v55, %v1329_v51  ;;  %v2739_v59 = vadd.f32 %v1408_v54, %v382_v52 }
  0xeb   :  { %v1332_v60 = vpop.f32.mrf.mxu0  ;;  %v1410_v63 = vpop.f32.mrf.mxu1 }
  0xec   :  { %v387_v62 = vadd.f32 %v1331_v57, %v2733_v47  ;;  %v1411_v0 = vadd.f32 %v1410_v63, %v1409_v58 }
  0xed   :  { %v1333_v1 = vpop.f32.mrf.mxu0  ;;  %v1412_v3 = vpop.f32.mrf.mxu1 }
  0xee   :  { %v1334_v2 = vadd.f32 %v1333_v1, %v1332_v60  ;;  %v2745_v4 = vadd.f32 %v1411_v0, %v387_v62 }
  0xef   :  { %v1335_v5 = vpop.f32.mrf.mxu0  ;;  %v1413_v7 = vpop.f32.mrf.mxu1 }
  0xf0   :  { %v392_v6 = vadd.f32 %v1334_v2, %v2733_v47  ;;  %v1414_v8 = vadd.f32 %v1413_v7, %v1412_v3 }
  0xf1   :  { %v1336_v9 = vpop.f32.mrf.mxu0  ;;  %v1415_v11 = vpop.f32.mrf.mxu1 }
  0xf2   :  { %v1337_v10 = vadd.f32 %v1336_v9, %v1335_v5  ;;  %v2748_v12 = vadd.f32 %v1414_v8, %v392_v6 }
  0xf3   :  { %v1338_v13 = vpop.f32.mrf.mxu0  ;;  %v1416_v15 = vpop.f32.mrf.mxu1 }
  0xf4   :  { %v397_v14 = vadd.f32 %v1337_v10, %v2733_v47  ;;  %v1417_v16 = vadd.f32 %v1416_v15, %v1415_v11 }
  0xf5   :  { %v1339_v17 = vpop.f32.mrf.mxu0  ;;  %v1418_v19 = vpop.f32.mrf.mxu1 }
  0xf6   :  { %v1340_v18 = vadd.f32 %v1339_v17, %v1338_v13  ;;  %v2751_v20 = vadd.f32 %v1417_v16, %v397_v14 }
  0xf7   :  { %v1341_v21 = vpop.f32.mrf.mxu0  ;;  %v1419_v23 = vpop.f32.mrf.mxu1 }
  0xf8   :  { %v402_v22 = vadd.f32 %v1340_v18, %v2733_v47  ;;  %v1420_v24 = vadd.f32 %v1419_v23, %v1418_v19 }
  0xf9   :  { %v1342_v25 = vpop.f32.mrf.mxu0  ;;  %v1421_v27 = vpop.f32.mrf.mxu1 }
  0xfa   :  { %v1343_v26 = vadd.f32 %v1342_v25, %v1341_v21  ;;  %v2754_v28 = vadd.f32 %v1420_v24, %v402_v22 }
  0xfb   :  { %v1344_v29 = vpop.f32.mrf.mxu0  ;;  %v1422_v31 = vpop.f32.mrf.mxu1 }
  0xfc   :  { %v407_v30 = vadd.f32 %v1343_v26, %v2733_v47  ;;  %v1423_v32 = vadd.f32 %v1422_v31, %v1421_v27 }
  0xfd   :  { %v1345_v33 = vpop.f32.mrf.mxu0  ;;  %v1424_v35 = vpop.f32.mrf.mxu1 }
  0xfe   :  { %v1346_v34 = vadd.f32 %v1345_v33, %v1344_v29  ;;  %v2757_v36 = vadd.f32 %v1423_v32, %v407_v30 }
  0xff   :  { %v1347_v37 = vpop.f32.mrf.mxu0  ;;  %v1425_v39 = vpop.f32.mrf.mxu1 }
 0x100   :  { %v412_v38 = vadd.f32 %v1346_v34, %v2733_v47  ;;  %v1426_v40 = vadd.f32 %v1425_v39, %v1424_v35 }
 0x101   :  { %v1348_v41 = vpop.f32.mrf.mxu0  ;;  %v1427_v43 = vpop.f32.mrf.mxu1 }
 0x102   :  { %v1349_v42 = vadd.f32 %v1348_v41, %v1347_v37  ;;  %v2760_v44 = vadd.f32 %v1426_v40, %v412_v38 }
 0x103   :  { %v1350_v45 = vpop.f32.mrf.mxu0  ;;  %v1428_v48 = vpop.f32.mrf.mxu1 }
 0x104   :  { %v417_v46 = vadd.f32 %v1349_v42, %v2733_v47  ;;  %v1429_v49 = vadd.f32 %v1428_v48, %v1427_v43 }
 0x105   :  { %v1351_v50 = vpop.f32.mrf.mxu0  ;;  %v1430_v52 = vpop.f32.mrf.mxu1 }
 0x106   :  { %v1352_v51 = vadd.f32 %v1351_v50, %v1350_v45  ;;  %v2763_v53 = vadd.f32 %v1429_v49, %v417_v46 }
 0x107   :  { %v1353_v54 = vpop.f32.mrf.mxu0  ;;  %v1431_v56 = vpop.f32.mrf.mxu1 }
 0x108   :  { %v422_v55 = vadd.f32 %v1352_v51, %v2733_v47  ;;  %v1432_v57 = vadd.f32 %v1431_v56, %v1430_v52 }
 0x109   :  { %v1354_v58 = vpop.f32.mrf.mxu0  ;;  %v1433_v61 = vpop.f32.mrf.mxu1 }
 0x10a   :  { %v1355_v60 = vadd.f32 %v1354_v58, %v1353_v54  ;;  %v2766_v62 = vadd.f32 %v1432_v57, %v422_v55 }
 0x10b   :  { %v1356_v63 = vpop.f32.mrf.mxu0  ;;  %v1434_v1 = vpop.f32.mrf.mxu1 }
 0x10c   :  { %v427_v0 = vadd.f32 %v1355_v60, %v2733_v47  ;;  %v1435_v2 = vadd.f32 %v1434_v1, %v1433_v61 }
 0x10d   :  { %v1357_v3 = vpop.f32.mrf.mxu0  ;;  %v1436_v6 = vpop.f32.mrf.mxu1 }
 0x10e   :  { %v1358_v5 = vadd.f32 %v1357_v3, %v1356_v63  ;;  %v2769_v7 = vadd.f32 %v1435_v2, %v427_v0 }
 0x10f   :  { %v1359_v8 = vpop.f32.mrf.mxu0  ;;  %v1437_v10 = vpop.f32.mrf.mxu1 }
 0x110   :  { %v432_v9 = vadd.f32 %v1358_v5, %v2733_v47  ;;  %v1438_v11 = vadd.f32 %v1437_v10, %v1436_v6 }
 0x111   :  { %v1360_v13 = vpop.f32.mrf.mxu0  ;;  %v1439_v15 = vpop.f32.mrf.mxu1 }
 0x112   :  { %v1361_v14 = vadd.f32 %v1360_v13, %v1359_v8  ;;  %v2772_v16 = vadd.f32 %v1438_v11, %v432_v9 }
 0x113   :  { %v1362_v17 = vpop.f32.mrf.mxu0  ;;  %v1440_v19 = vpop.f32.mrf.mxu1 }
 0x114   :  { %2996 = vst [vmem:[#allocation3_spill] sm:$0xff] %v2772_v16  ;;  %v437_v18 = vadd.f32 %v1361_v14, %v2733_v47  ;;  %v1441_v21 = vadd.f32 %v1440_v19, %v1439_v15 }
 0x115   :  { %v1363_v22 = vpop.f32.mrf.mxu0  ;;  %v1442_v24 = vpop.f32.mrf.mxu1 }
 0x116   :  { %v1364_v23 = vadd.f32 %v1363_v22, %v1362_v17  ;;  %v2775_v25 = vadd.f32 %v1441_v21, %v437_v18 }
 0x117   :  { %v1365_v26 = vpop.f32.mrf.mxu0  ;;  %v1443_v29 = vpop.f32.mrf.mxu1 }
 0x118   :  { %2997 = vst [vmem:[#allocation4_spill] sm:$0xff] %v2775_v25  ;;  %v442_v27 = vadd.f32 %v1364_v23, %v2733_v47  ;;  %v1444_v30 = vadd.f32 %v1443_v29, %v1442_v24 }
 0x119   :  { %v1366_v31 = vpop.f32.mrf.mxu0  ;;  %v1445_v33 = vpop.f32.mrf.mxu1 }
 0x11a   :  { %v1367_v32 = vadd.f32 %v1366_v31, %v1365_v26  ;;  %v2778_v34 = vadd.f32 %v1444_v30, %v442_v27 }
 0x11b   :  { %v1368_v35 = vpop.f32.mrf.mxu0  ;;  %v1446_v38 = vpop.f32.mrf.mxu1 }
 0x11c   :  { %2998 = vst [vmem:[#allocation5_spill] sm:$0xff] %v2778_v34  ;;  %v447_v37 = vadd.f32 %v1367_v32, %v2733_v47  ;;  %v1447_v39 = vadd.f32 %v1446_v38, %v1445_v33 }
 0x11d   :  { %v1369_v40 = vpop.f32.mrf.mxu0 }
 0x11e   :  { %v1370_v41 = vadd.f32 %v1369_v40, %v1368_v35  ;;  %v1448_v42 = vpop.f32.mrf.mxu1  ;;  %v2781_v43 = vadd.f32 %v1447_v39, %v447_v37 }
 0x11f   :  { %v1371_v45 = vpop.f32.mrf.mxu0 }
 0x120   :  { %2999 = vst [vmem:[#allocation6_spill] sm:$0xff] %v2781_v43  ;;  %v452_v46 = vadd.f32 %v1370_v41, %v2733_v47  ;;  %v1449_v48 = vpop.f32.mrf.mxu1 }
 0x121   :  { %v1450_v49 = vadd.f32 %v1449_v48, %v1448_v42  ;;  %v1372_v50 = vpop.f32.mrf.mxu0 }
 0x122   :  { %v2784_v51 = vadd.f32 %v1372_v50, %v1371_v45  ;;  %v2786_v52 = vpop.f32.mrf.mxu1 }
 0x123   :  { %3001 = vst [vmem:[#allocation8_spill] sm:$0xff] %v2786_v52  ;;  %v2788_v54 = vadd.f32 %v1450_v49, %v452_v46  ;;  %v1486_v55 = vpop.f32.mrf.mxu0 }
 0x124   :  { %3000 = vst [vmem:[#allocation7_spill] sm:$0xff] %v2784_v51  ;;  %v2790_v56 = vpop.f32.mrf.mxu1 }
 0x125   :  { %3002 = vst [vmem:[#allocation9_spill] sm:$0xff] %v2788_v54  ;;  %3003 = vst [vmem:[#allocation10_spill] sm:$0xff] %v2790_v56  ;;  %v1487_v57 = vpop.f32.mrf.mxu0 }
 0x126   :  { %v1566_v58 = vpop.f32.mrf.mxu1 }
 0x127   :  { %v1489_v60 = vpop.f32.mrf.mxu0 }
 0x128   :  { %v1567_v61 = vpop.f32.mrf.mxu1 }
 0x129   :  { %v1490_v63 = vpop.f32.mrf.mxu0 }
 0x12a   :  { %v1569_v0 = vpop.f32.mrf.mxu1  ;;  %v1491_v51 = vadd.f32 %v1490_v63, %v1489_v60 }
 0x12b   :  { %v1492_v1 = vpop.f32.mrf.mxu0 }
 0x12c   :  { %v1570_v2 = vpop.f32.mrf.mxu1 }
 0x12d   :  { %v1493_v3 = vpop.f32.mrf.mxu0 }
 0x12e   :  { %v2792_v5 = vpop.f32.mrf.mxu1 }
 0x12f   :  { %v1495_v6 = vpop.f32.mrf.mxu0 }
 0x130   :  { %v1573_v8 = vpop.f32.mrf.mxu1 }
 0x131   :  { %v1496_v9 = vpop.f32.mrf.mxu0 }
 0x132   :  { %v1575_v10 = vpop.f32.mrf.mxu1 }
 0x133   :  { %v1498_v11 = vpop.f32.mrf.mxu0 }
 0x134   :  { %v1576_v13 = vpop.f32.mrf.mxu1 }
 0x135   :  { %v1499_v14 = vpop.f32.mrf.mxu0 }
 0x136   :  { %v2794_v15 = vpop.f32.mrf.mxu1 }
 0x137   :  { %v1501_v17 = vpop.f32.mrf.mxu0 }
 0x138   :  { %v2796_v18 = vpop.f32.mrf.mxu1 }
 0x139   :  { %v1502_v19 = vpop.f32.mrf.mxu0 }
 0x13a   :  { %v1581_v21 = vpop.f32.mrf.mxu1  ;;  %v1503_v60 = vadd.f32 %v1502_v19, %v1501_v17 }
 0x13b   :  { %v2798_v22 = vpop.f32.mrf.mxu0 }
 0x13c   :  { %v1582_v23 = vpop.f32.mrf.mxu1 }
 0x13d   :  { %v2800_v24 = vpop.f32.mrf.mxu0 }
 0x13e   :  { %v2802_v26 = vpop.f32.mrf.mxu1 }
 0x13f   :  { %v1507_v27 = vpop.f32.mrf.mxu0 }
 0x140   :  { %v2804_v29 = vpop.f32.mrf.mxu1 }
 0x141   :  { %v1508_v30 = vpop.f32.mrf.mxu0 }
 0x142   :  { %v2806_v31 = vpop.f32.mrf.mxu1 }
 0x143   :  { %v2808_v32 = vpop.f32.mrf.mxu0 }
 0x144   :  { %v2810_v33 = vpop.f32.mrf.mxu1 }
 0x145   :  { %v2812_v35 = vpop.f32.mrf.mxu0 }
 0x146   :  { %v2814_v37 = vpop.f32.mrf.mxu1 }
 0x147   :  { %v1513_v38 = vpop.f32.mrf.mxu0 }
 0x148   :  { %v2816_v39 = vpop.f32.mrf.mxu1 }
 0x149   :  { %3004 = vst [vmem:[#allocation11_spill] sm:$0xff] %v2816_v39  ;;  %v1514_v40 = vpop.f32.mrf.mxu0 }
 0x14a   :  { %v2818_v41 = vpop.f32.mrf.mxu1 }
 0x14b   :  { %v2820_v42 = vpop.f32.mrf.mxu0 }
 0x14c   :  { %3005 = vst [vmem:[#allocation12_spill] sm:$0xff] %v2820_v42  ;;  %v2822_v45 = vpop.f32.mrf.mxu1  ;;  %v1571_v42 = vadd.f32 %v1570_v2, %v1569_v0  ;;  %v1574_v0 = vadd.f32 %v1573_v8, %v2792_v5  ;;  %v1515_v5 = vadd.f32 %v1514_v40, %v1513_v38 }
 0x14d   :  { %v2824_v46 = vpop.f32.mrf.mxu0 }
 0x14e   :  { %3006 = vst [vmem:[#allocation13_spill] sm:$0xff] %v2824_v46  ;;  %v2826_v48 = vpop.f32.mrf.mxu1 }
 0x14f   :  { %3007 = vst [vmem:[#allocation14_spill] sm:$0xff] %v2826_v48  ;;  %v2828_v49 = vpop.f32.mrf.mxu0 }
 0x150   :  { %v2830_v50 = vpop.f32.mrf.mxu1 }
 0x151   :  { %3008 = vst [vmem:[#allocation15_spill] sm:$0xff] %v2830_v50  ;;  %v2832_v54 = vpop.f32.mrf.mxu0  ;;  %v1488_v50 = vadd.f32 %v1487_v57, %v1486_v55  ;;  %v1577_v55 = vadd.f32 %v1576_v13, %v1575_v10 }
 0x152   :  { %v2834_v34 = vpop.f32.mrf.mxu1 }
 0x153   :  { %3009 = vst [vmem:[#allocation16_spill] sm:$0xff] %v2834_v34  ;;  %v2836_v43 = vpop.f32.mrf.mxu0  ;;  %v677_v34 = vadd.f32 %v1491_v51, %v2745_v4 }
 0x154   :  { %3010 = vst [vmem:[#allocation17_spill] sm:$0xff] %v2836_v43  ;;  %v2840_v25 = vpop.f32.mrf.mxu1  ;;  %v1497_v43 = vadd.f32 %v1496_v9, %v1495_v6 }
 0x155   :  { %v2838_v16 = vpop.f32.mrf.mxu0  ;;  %3012 = vst [vmem:[#allocation19_spill] sm:$0xff] %v2840_v25  ;;  %v672_v25 = vadd.f32 %v1488_v50, %v2739_v59  ;;  %v822_v57 = vadd.f32 %v1571_v42, %v677_v34  ;;  %v697_v59 = vadd.f32 %v1503_v60, %v2757_v36  ;;  %v1580_v34 = vadd.f32 %v2796_v18, %v2794_v15  ;;  %v3019_v60 = vld [vmem:[#allocation12_spill] sm:$0xff] }
 0x156   :  { %3011 = vst [vmem:[#allocation18_spill] sm:$0xff] %v2838_v16  ;;  %v2846_v48 = vpop.f32.mrf.mxu1  ;;  %v1512_v15 = vadd.f32 %v2812_v35, %v2808_v32 }
 0x157   :  { %v2842_v56 = vpop.f32.mrf.mxu0  ;;  %3015 = vst [vmem:[#allocation22_spill] sm:$0xff] %v2846_v48 }
 0x158   :  { %3013 = vst [vmem:[#allocation20_spill] sm:$0xff] %v2842_v56  ;;  %v2853_v39 = vpop.f32.mrf.mxu1  ;;  %v1568_v56 = vadd.f32 %v1567_v61, %v1566_v58  ;;  %v1583_v58 = vadd.f32 %v1582_v23, %v1581_v21 }
 0x159   :  { %v2844_v52 = vpop.f32.mrf.mxu0 }
 0x15a   :  { %3014 = vst [vmem:[#allocation21_spill] sm:$0xff] %v2844_v52  ;;  %v1494_v52 = vadd.f32 %v1493_v3, %v1492_v1  ;;  %v2861_v48 = vpop.f32.mrf.mxu1  ;;  %v817_v6 = vadd.f32 %v1568_v56, %v672_v25  ;;  %v1509_v1 = vadd.f32 %v1508_v30, %v1507_v27  ;;  %v717_v30 = vadd.f32 %v1515_v5, %v2769_v7 }
 0x15b   :  { %v2848_v47 = vpop.f32.mrf.mxu0 }
 0x15c   :  { %3016 = vst [vmem:[#allocation23_spill] sm:$0xff] %v2848_v47  ;;  %v687_v47 = vadd.f32 %v1497_v43, %v2751_v20  ;;  %v682_v51 = vadd.f32 %v1494_v52, %v2748_v12  ;;  %v2869_v43 = vpop.f32.mrf.mxu1  ;;  %v1506_v52 = vadd.f32 %v2800_v24, %v2798_v22  ;;  %v1586_v24 = vadd.f32 %v2804_v29, %v2802_v26  ;;  %v3018_v26 = vld [vmem:[#allocation11_spill] sm:$0xff] }
 0x15d   :  { %v2850_v46 = vpop.f32.mrf.mxu0  ;;  %v1592_v29 = vadd.f32 %v3018_v26, %v2814_v37 }
 0x15e   :  { %3017 = vst [vmem:[#allocation24_spill] sm:$0xff] %v2850_v46  ;;  %v1500_v46 = vadd.f32 %v1499_v14, %v1498_v11  ;;  %v832_v9 = vadd.f32 %v1577_v55, %v687_v47  ;;  %v827_v36 = vadd.f32 %v1574_v0, %v682_v51  ;;  %v842_v11 = vadd.f32 %v1583_v58, %v697_v59  ;;  %v2878_v17 = vpop.f32.mrf.mxu1  ;;  %v3020_v55 = vld [vmem:[#allocation13_spill] sm:$0xff]  ;;  %v3023_v0 = vld [vmem:[#allocation8_spill] sm:$0xff] }
 0x15f   :  { %v2855_v16 = vpop.f32.mrf.mxu0  ;;  %v707_v47 = vadd.f32 %v1509_v1, %v2763_v53  ;;  %v702_v23 = vadd.f32 %v1506_v52, %v2760_v44  ;;  %v712_v44 = vadd.f32 %v1512_v15, %v2766_v62  ;;  %v3027_v1 = vld [vmem:[#allocation4_spill] sm:$0xff]  ;;  %v3030_v52 = vld [vmem:[#allocation17_spill] sm:$0xff]  ;;  %v3034_v15 = vld [vmem:[#allocation15_spill] sm:$0xff] }
 0x160   :  { %v692_v20 = vadd.f32 %v1500_v46, %v2754_v28  ;;  %v1589_v28 = vadd.f32 %v2810_v33, %v2806_v31  ;;  %v1595_v31 = vadd.f32 %v2822_v45, %v2818_v41  ;;  %v1521_v33 = vadd.f32 %v2832_v54, %v2828_v49  ;;  %v1609_v42 = vpop.f32.mrf.mxu1  ;;  %v3021_v54 = vld [vmem:[#allocation2_spill] sm:$0xff]  ;;  %v3022_v49 = vld [vmem:[#allocation7_spill] sm:$0xff] }
 0x161   :  { %v2858_v63 = vpop.f32.mrf.mxu0  ;;  %v1518_v41 = vadd.f32 %v3020_v55, %v3019_v60  ;;  %v457_v51 = vadd.f32 %v3022_v49, %v3021_v54  ;;  %v3026_v59 = vld [vmem:[#allocation21_spill] sm:$0xff] }
 0x162   :  { %v837_v22 = vadd.f32 %v1580_v34, %v692_v20  ;;  %v852_v40 = vadd.f32 %v1589_v28, %v707_v47  ;;  %v3029_v20 = vld [vmem:[#allocation19_spill] sm:$0xff]  ;;  %v857_v47 = vadd.f32 %v1592_v29, %v712_v44 }
 0x163   :  { %v1712_v4 = vpop.f32.mrf.mxu0  ;;  %v3032_v28 = vld [vmem:[#allocation3_spill] sm:$0xff] }
 0x164   :  { %v967_v2 = vadd.f32 %v1712_v4, %v822_v57  ;;  %v847_v4 = vadd.f32 %v1586_v24, %v702_v23  ;;  %v3035_v23 = vld [vmem:[#allocation6_spill] sm:$0xff] }
 0x165   :  { %v961_v61 = vpop.f32.mrf.mxu0  ;;  %v3039_v60 = vld [vmem:[#allocation24_spill] sm:$0xff] }
 0x166   :  { %v962_v3 = vadd.f32 %v961_v61, %v817_v6  ;;  %v1041_v10 = vmax.f32 %v967_v2, 0.0  ;;  %v3024_v2 = vld [vmem:[#allocation10_spill] sm:$0xff]  ;;  %v3025_v6 = vld [vmem:[#allocation20_spill] sm:$0xff]  ;;  %v862_v61 = vadd.f32 %v1595_v31, %v717_v30  ;;  %v1533_v30 = vadd.f32 %v2858_v63, %v2855_v16 }
 0x167   :  { %v1715_v12 = vpop.f32.mrf.mxu0  ;;  %v1453_v62 = vadd.f32 %v3024_v2, %v3023_v0  ;;  %v1527_v37 = vadd.f32 %v3026_v59, %v3025_v6  ;;  %v3040_v2 = vld [vmem:[#allocation9_spill] sm:$0xff]  ;;  %v1610_v6 = vadd.f32 %v1609_v42, %v2878_v17 }
 0x168   :  { %v1040_v25 = vmax.f32 %v962_v3, 0.0  ;;  %v977_v56 = vadd.f32 %v1715_v12, %v832_v9  ;;  %v1057_v18 = vmin.f32 %v1041_v10, 6.0  ;;  %v727_v3 = vadd.f32 %v1521_v33, %v3027_v1  ;;  %v3028_v9 = vld [vmem:[#allocation16_spill] sm:$0xff] }
 0x169   :  { %v971_v8 = vpop.f32.mrf.mxu0  ;;  %v1601_v34 = vadd.f32 %v3029_v20, %v3028_v9  ;;  %v737_v24 = vadd.f32 %v1527_v37, %v3035_v23 }
 0x16a   :  { %v1056_v13 = vmin.f32 %v1040_v25, 6.0  ;;  %v972_v14 = vadd.f32 %v971_v8, %v827_v36  ;;  %v1043_v19 = vmax.f32 %v977_v56, 0.0  ;;  %v3031_v25 = vld [vmem:[#allocation18_spill] sm:$0xff]  ;;  %v1611_v36 = vpop.f32.mrf.mxu1 }
 0x16b   :  { %v1718_v21 = vpop.f32.mrf.mxu0  ;;  %v1524_v56 = vadd.f32 %v3031_v25, %v3030_v52  ;;  %v872_v33 = vadd.f32 %v1601_v34, %v727_v3 }
 0x16c   :  { %v1042_v53 = vmax.f32 %v972_v14, 0.0  ;;  %v987_v27 = vadd.f32 %v1718_v21, %v842_v11  ;;  %1766 = vmatprep.mubr.f32.mxu1 %v1056_v13  ;;  %v1059_v46 = vmin.f32 %v1043_v19, 6.0  ;;  %v722_v13 = vadd.f32 %v1518_v41, %v3032_v28  ;;  %v3033_v14 = vld [vmem:[#allocation14_spill] sm:$0xff]  ;;  %v1612_v26 = vpop.f32.mrf.mxu1 }
 0x16d   :  { %v981_v32 = vpop.f32.mrf.mxu0  ;;  %1767 = vmatmul.mubr.f32.vlgmr.msra.gmra.mxu1 %v1057_v18  ;;  %v1598_v18 = vadd.f32 %v3034_v15, %v3033_v14 }
 0x16e   :  { %v1058_v35 = vmin.f32 %v1042_v53, 6.0  ;;  %v982_v38 = vadd.f32 %v981_v32, %v837_v22  ;;  %v1045_v50 = vmax.f32 %v987_v27, 0.0  ;;  %v602_v22 = vadd.f32 %v1453_v62, %v457_v51 }
 0x16f   :  { %v1721_v7 = vpop.f32.mrf.mxu0  ;;  %v1607_v53 = vadd.f32 %v2869_v43, %v2861_v48  ;;  %v867_v41 = vadd.f32 %v1598_v18, %v722_v13 }
 0x170   :  { %v1044_v45 = vmax.f32 %v982_v38, 0.0  ;;  %v997_v57 = vadd.f32 %v1721_v7, %v852_v40  ;;  %1769 = vmatprep.mubr.f32.mxu1 %v1058_v35  ;;  %v1061_v5 = vmin.f32 %v1045_v50, 6.0  ;;  %v3036_v35 = vld [vmem:[#allocation5_spill] sm:$0xff]  ;;  %v3037_v40 = vld [vmem:[#allocation22_spill] sm:$0xff]  ;;  %v3038_v7 = vld [vmem:[#allocation23_spill] sm:$0xff] }
 0x171   :  { %v991_v58 = vpop.f32.mrf.mxu0  ;;  %1770 = vmatmul.mubr.f32.gmra.mxu1 %v1059_v46  ;;  %v732_v38 = vadd.f32 %v1524_v56, %v3036_v35  ;;  %v1604_v44 = vadd.f32 %v2853_v39, %v3037_v40  ;;  %v1530_v48 = vadd.f32 %v3039_v60, %v3038_v7  ;;  %v882_v63 = vadd.f32 %v1607_v53, %v737_v24 }
 0x172   :  { %v1060_v10 = vmin.f32 %v1044_v45, 6.0  ;;  %v992_v12 = vadd.f32 %v991_v58, %v847_v4  ;;  %v1047_v8 = vmax.f32 %v997_v57, 0.0  ;;  %v747_v45 = vadd.f32 %v1533_v30, %v602_v22 }
 0x173   :  { %v1724_v11 = vpop.f32.mrf.mxu0  ;;  %v1613_v57 = vadd.f32 %v1612_v26, %v1611_v36  ;;  %v877_v0 = vadd.f32 %v1604_v44, %v732_v38  ;;  %v742_v62 = vadd.f32 %v1530_v48, %v3040_v2 }
 0x174   :  { %v1046_v19 = vmax.f32 %v992_v12, 0.0  ;;  %v1007_v21 = vadd.f32 %v1724_v11, %v862_v61  ;;  %1772 = vmatprep.mubr.f32.mxu1 %v1060_v10  ;;  %v1063_v29 = vmin.f32 %v1047_v8, 6.0 }
 0x175   :  { %v1001_v27 = vpop.f32.mrf.mxu0  ;;  %1773 = vmatmul.mubr.f32.gmra.mxu1 %v1061_v5  ;;  %v892_v3 = vadd.f32 %v1613_v57, %v747_v45  ;;  %v887_v52 = vadd.f32 %v1610_v6, %v742_v62 }
 0x176   :  { %v1062_v31 = vmin.f32 %v1046_v19, 6.0  ;;  %v1002_v32 = vadd.f32 %v1001_v27, %v857_v47  ;;  %v1049_v46 = vmax.f32 %v1007_v21, 0.0  ;;  %v2922_v47 = vld [vmem:[%s2992_s4] ss:$0 sm:$0xff] }
 0x177   :  { %v1727_v50 = vpop.f32.mrf.mxu0 }
 0x178   :  { %v1048_v43 = vmax.f32 %v1002_v32, 0.0  ;;  %v1017_v55 = vadd.f32 %v1727_v50, %v872_v33  ;;  %1775 = vmatprep.mubr.f32.mxu1 %v1062_v31  ;;  %v1065_v49 = vmin.f32 %v1049_v46, 6.0 }
 0x179   :  { %v1011_v16 = vpop.f32.mrf.mxu0  ;;  %1776 = vmatmul.mubr.f32.gmra.mxu1 %v1063_v29 }
 0x17a   :  { %v1064_v4 = vmin.f32 %v1048_v43, 6.0  ;;  %v1012_v54 = vadd.f32 %v1011_v16, %v867_v41  ;;  %v1051_v39 = vmax.f32 %v1017_v55, 0.0 }
 0x17b   :  { %v1730_v51 = vpop.f32.mrf.mxu0 }
 0x17c   :  { %v1050_v59 = vmax.f32 %v1012_v54, 0.0  ;;  %v1027_v37 = vadd.f32 %v1730_v51, %v882_v63  ;;  %1778 = vmatprep.mubr.f32.mxu1 %v1064_v4  ;;  %v1067_v9 = vmin.f32 %v1051_v39, 6.0 }
 0x17d   :  { %v1021_v58 = vpop.f32.mrf.mxu0  ;;  %1779 = vmatmul.mubr.f32.gmra.mxu1 %v1065_v49 }
 0x17e   :  { %v1066_v61 = vmin.f32 %v1050_v59, 6.0  ;;  %v1022_v1 = vadd.f32 %v1021_v58, %v877_v0  ;;  %v1053_v20 = vmax.f32 %v1027_v37, 0.0 }
 0x17f   :  { %v1733_v34 = vpop.f32.mrf.mxu0 }
 0x180   :  { %v1052_v10 = vmax.f32 %v1022_v1, 0.0  ;;  %v1037_v12 = vadd.f32 %v1733_v34, %v892_v3  ;;  %1781 = vmatprep.mubr.f32.mxu1 %v1066_v61  ;;  %v1069_v17 = vmin.f32 %v1053_v20, 6.0 }
 0x181   :  { %v1031_v25 = vpop.f32.mrf.mxu0  ;;  %1782 = vmatmul.mubr.f32.gmra.mxu1 %v1067_v9 }
 0x182   :  { %v1068_v56 = vmin.f32 %v1052_v10, 6.0  ;;  %v1032_v36 = vadd.f32 %v1031_v25, %v887_v52  ;;  %v1055_v42 = vmax.f32 %v1037_v12, 0.0 }
 0x184   :  { %v1054_v5 = vmax.f32 %v1032_v36, 0.0  ;;  %1784 = vmatprep.mubr.f32.mxu1 %v1068_v56  ;;  %v1071_v11 = vmin.f32 %v1055_v42, 6.0 }
 0x185   :  { %1785 = vmatmul.mubr.f32.gmra.mxu1 %v1069_v17 }
 0x186   :  { %v1070_v8 = vmin.f32 %v1054_v5, 6.0 }
 0x188   :  { %1787 = vmatprep.mubr.f32.mxu1 %v1070_v8 }
 0x189   :  { %1788 = vmatmul.mubr.f32.gmra.mxu1 %v1071_v11 }
 0x22d   :  { %v1768_v28 = vpop.f32.mrf.mxu1 }
 0x22e   :  { %v1167_v13 = vadd.f32 %v1768_v28, %v2922_v47 }
 0x22f   :  { %v1161_v14 = vpop.f32.mrf.mxu1 }
 0x230   :  { %v1241_v15 = vmax.f32 %v1167_v13, 0.0  ;;  %v1162_v18 = vadd.f32 %v2922_v47, %v1161_v14 }
 0x231   :  { %v1771_v19 = vpop.f32.mrf.mxu1 }
 0x232   :  { %v1257_v21 = vmin.f32 %v1241_v15, 6.0  ;;  %v1240_v22 = vmax.f32 %v1162_v18, 0.0  ;;  %v1177_v23 = vadd.f32 %v1771_v19, %v2922_v47 }
 0x233   :  { %v1171_v24 = vpop.f32.mrf.mxu1 }
 0x234   :  { %1273 = vst [vmem:[%s2993_s5 + $0x8] sm:$0xff] %v1257_v21  ;;  %v1256_v53 = vmin.f32 %v1240_v22, 6.0  ;;  %v1243_v27 = vmax.f32 %v1177_v23, 0.0  ;;  %v1172_v30 = vadd.f32 %v2922_v47, %v1171_v24 }
 0x235   :  { %v1774_v31 = vpop.f32.mrf.mxu1 }
 0x236   :  { %1272 = vst [vmem:[%s2993_s5] sm:$0xff] %v1256_v53  ;;  %v1259_v32 = vmin.f32 %v1243_v27, 6.0  ;;  %v1242_v33 = vmax.f32 %v1172_v30, 0.0  ;;  %v1187_v35 = vadd.f32 %v1774_v31, %v2922_v47 }
 0x237   :  { %v1181_v38 = vpop.f32.mrf.mxu1 }
 0x238   :  { %1275 = vst [vmem:[%s2993_s5 + $0x18] sm:$0xff] %v1259_v32  ;;  %v1258_v40 = vmin.f32 %v1242_v33, 6.0  ;;  %v1245_v44 = vmax.f32 %v1187_v35, 0.0  ;;  %v1182_v26 = vadd.f32 %v2922_v47, %v1181_v38 }
 0x239   :  { %v1777_v29 = vpop.f32.mrf.mxu1 }
 0x23a   :  { %1274 = vst [vmem:[%s2993_s5 + $0x10] sm:$0xff] %v1258_v40  ;;  %v1261_v46 = vmin.f32 %v1245_v44, 6.0  ;;  %v1244_v50 = vmax.f32 %v1182_v26, 0.0  ;;  %v1197_v7 = vadd.f32 %v1777_v29, %v2922_v47 }
 0x23b   :  { %v1191_v60 = vpop.f32.mrf.mxu1 }
 0x23c   :  { %1277 = vst [vmem:[%s2993_s5 + $0x28] sm:$0xff] %v1261_v46  ;;  %v1260_v48 = vmin.f32 %v1244_v50, 6.0  ;;  %v1247_v43 = vmax.f32 %v1197_v7, 0.0  ;;  %v1192_v55 = vadd.f32 %v2922_v47, %v1191_v60 }
 0x23d   :  { %v1780_v41 = vpop.f32.mrf.mxu1 }
 0x23e   :  { %1276 = vst [vmem:[%s2993_s5 + $0x20] sm:$0xff] %v1260_v48  ;;  %v1263_v16 = vmin.f32 %v1247_v43, 6.0  ;;  %v1246_v63 = vmax.f32 %v1192_v55, 0.0  ;;  %v1207_v45 = vadd.f32 %v1780_v41, %v2922_v47 }
 0x23f   :  { %v1201_v57 = vpop.f32.mrf.mxu1 }
 0x240   :  { %1279 = vst [vmem:[%s2993_s5 + $0x38] sm:$0xff] %v1263_v16  ;;  %v1262_v4 = vmin.f32 %v1246_v63, 6.0  ;;  %v1249_v54 = vmax.f32 %v1207_v45, 0.0  ;;  %v1202_v49 = vadd.f32 %v2922_v47, %v1201_v57 }
 0x241   :  { %v1783_v39 = vpop.f32.mrf.mxu1 }
 0x242   :  { %1278 = vst [vmem:[%s2993_s5 + $0x30] sm:$0xff] %v1262_v4  ;;  %v1265_v51 = vmin.f32 %v1249_v54, 6.0  ;;  %v1248_v0 = vmax.f32 %v1202_v49, 0.0  ;;  %v1217_v2 = vadd.f32 %v1783_v39, %v2922_v47 }
 0x243   :  { %v1211_v62 = vpop.f32.mrf.mxu1 }
 0x244   :  { %1281 = vst [vmem:[%s2993_s5 + $0x48] sm:$0xff] %v1265_v51  ;;  %v1264_v6 = vmin.f32 %v1248_v0, 6.0  ;;  %v1251_v59 = vmax.f32 %v1217_v2, 0.0  ;;  %v1212_v37 = vadd.f32 %v2922_v47, %v1211_v62 }
 0x245   :  { %v1786_v58 = vpop.f32.mrf.mxu1 }
 0x246   :  { %1280 = vst [vmem:[%s2993_s5 + $0x40] sm:$0xff] %v1264_v6  ;;  %v1267_v61 = vmin.f32 %v1251_v59, 6.0  ;;  %v1250_v1 = vmax.f32 %v1212_v37, 0.0  ;;  %v1227_v3 = vadd.f32 %v1786_v58, %v2922_v47 }
 0x247   :  { %v1221_v9 = vpop.f32.mrf.mxu1 }
 0x248   :  { %1283 = vst [vmem:[%s2993_s5 + $0x58] sm:$0xff] %v1267_v61  ;;  %v1266_v20 = vmin.f32 %v1250_v1, 6.0  ;;  %v1253_v34 = vmax.f32 %v1227_v3, 0.0  ;;  %v1222_v10 = vadd.f32 %v2922_v47, %v1221_v9 }
 0x249   :  { %v1789_v12 = vpop.f32.mrf.mxu1 }
 0x24a   :  { %1282 = vst [vmem:[%s2993_s5 + $0x50] sm:$0xff] %v1266_v20  ;;  %v1269_v52 = vmin.f32 %v1253_v34, 6.0  ;;  %v1252_v25 = vmax.f32 %v1222_v10, 0.0  ;;  %v1237_v56 = vadd.f32 %v1789_v12, %v2922_v47 }
 0x24b   :  { %v1231_v36 = vpop.f32.mrf.mxu1 }
 0x24c   :  { %1285 = vst [vmem:[%s2993_s5 + $0x68] sm:$0xff] %v1269_v52  ;;  %v1268_v17 = vmin.f32 %v1252_v25, 6.0  ;;  %v1255_v42 = vmax.f32 %v1237_v56, 0.0  ;;  %v1232_v5 = vadd.f32 %v2922_v47, %v1231_v36 }
 0x24e   :  { %1284 = vst [vmem:[%s2993_s5 + $0x60] sm:$0xff] %v1268_v17  ;;  %v1271_v8 = vmin.f32 %v1255_v42, 6.0  ;;  %v1254_v11 = vmax.f32 %v1232_v5, 0.0 }
 0x250   :  { %1287 = vst [vmem:[%s2993_s5 + $0x78] sm:$0xff] %v1271_v8  ;;  %v1270_v28 = vmin.f32 %v1254_v11, 6.0 }
 0x252   :  { %1286 = vst [vmem:[%s2993_s5 + $0x70] sm:$0xff] %v1270_v28 }

</bundles_post_ra>
